<compile_context>
chip_gen: v6e
topology: v6e:2x2x1
jax: 0.10.0
libtpu: 0.0.40
codegen_flags: <defaults>
</compile_context>

<pallas_src>
import functools

import jax
import jax.numpy as jnp
import numpy as np
from jax.experimental import pallas as pl
from jax.experimental.pallas import tpu as pltpu

NUM_FEATURES = 2048   # fixed by get_backbone()
HIDDEN = 512          # fixed by get_head()
BN_EPS = 1e-5
LANE = 128


def head_kernel(feat_ref, w1_ref, b1_ref, w2_ref, b2_ref, out_ref, *, inv_hw):
    # feat_ref: (TN, HW, C) bf16, channels-last so the lane axis (C=2048) is dense.
    # Mean pool over the spatial (sublane) axis: f32-accumulating sum straight from
    # bf16, then one scalar 1/HW multiply.  Keeping 1/HW here (instead of folding it
    # into w1) keeps the pooled values at activation scale before the bf16 MXU cast.
    pooled = jnp.sum(feat_ref[...], axis=1, dtype=jnp.float32) * inv_hw       # (TN, C)

    # BatchNorm1d(2048) folded into w1/b1; Linear(2048 -> 512, bias=False):
    # bf16 MXU matmul with f32 accumulation.
    h = jnp.dot(pooled.astype(jnp.bfloat16), w1_ref[...],
                preferred_element_type=jnp.float32) + b1_ref[...]             # (TN, 512)
    h = jnp.maximum(h, 0.0)                                                   # ReLU

    # BatchNorm1d(512) folded into w2/b2; Linear(512 -> L_pad): tiny bf16 MXU matmul.
    out_ref[...] = jnp.dot(h.astype(jnp.bfloat16), w2_ref[...],
                           preferred_element_type=jnp.float32) + b2_ref[...]  # (TN, L_pad)


def _round_up(x, m):
    return ((x + m - 1) // m) * m


def _pick_tile_n(N, HW, C, budget_bytes=12 * 1024 * 1024):
    """Batch-tile size from the VMEM budget: largest bf16 feat tile <= ~12 MiB
    (double-buffered -> ~24 MiB), multiple of 8 sublanes, and >= 2 grid steps
    whenever the batch allows it (so both v7x TensorCores get work)."""
    if N <= 8:
        return N                                      # single full-extent block
    tn = max(8, (budget_bytes // (HW * C * 2)) // 8 * 8)
    tn = min(tn, _round_up(N, 8))
    if tn >= N:                                       # would be a 1-step grid
        tn = max(8, _round_up(pl.cdiv(N, 2), 8))
    return tn


def classifier_head(feat_nhwc, params):
    """Head of `Classifier` (eval mode) on a channels-last backbone feature map.

    feat_nhwc: (N, H, W, 2048), ideally already bf16 channels-last (as the backbone's
    last op can emit directly) -> no transpose / cast pass over the dominant tensor.
    Returns (N, num_layers) float32 logits.
    """
    N, H, W, C = feat_nhwc.shape
    assert C == NUM_FEATURES
    HW = H * W
    num_layers = params["w2"].shape[1]

    feat = feat_nhwc.reshape(N, HW, C)                # free reshape (contiguous)
    if feat.dtype != jnp.bfloat16:                    # skipped when producer emits bf16
        feat = feat.astype(jnp.bfloat16)

    # ---- fold eval-mode BatchNorms into the Linear layers (host-side algebra) ----
    def bn_scale_shift(gamma, beta, mean, var):
        scale = gamma / jnp.sqrt(var + BN_EPS)
        return scale, beta - mean * scale

    s1, t1 = bn_scale_shift(params["bn1_gamma"], params["bn1_beta"],
                            params["bn1_mean"], params["bn1_var"])
    s2, t2 = bn_scale_shift(params["bn2_gamma"], params["bn2_beta"],
                            params["bn2_mean"], params["bn2_var"])

    # mean-pool -> BN1 -> W1   ==   mean-pool @ (s1[:,None] * W1)  +  t1 @ W1
    w1 = (s1[:, None] * params["w1"]).astype(jnp.bfloat16)              # (2048, 512)
    b1 = (t1 @ params["w1"]).reshape(1, HIDDEN).astype(jnp.float32)     # (1, 512)
    # ReLU -> BN2 -> W2 + b2   ==   relu @ (s2[:,None] * W2)  +  (b2 + t2 @ W2)
    w2 = s2[:, None] * params["w2"]                                     # (512, L)
    b2 = params["b2"] + t2 @ params["w2"]                               # (L,)

    # Pad the output lane dim to a multiple of 128 -> unmasked, lane-dense stores.
    L_pad = _round_up(max(num_layers, LANE), LANE)
    w2 = jnp.pad(w2, ((0, 0), (0, L_pad - num_layers))).astype(jnp.bfloat16)
    b2 = jnp.pad(b2, (0, L_pad - num_layers)).reshape(1, L_pad).astype(jnp.float32)

    # Ragged batches handled by a cdiv grid with a masked trailing block -- no
    # jnp.pad copy of the feature map.  Junk rows in the last block are discarded
    # by the masked writeback (rows are fully independent).
    TN = _pick_tile_n(N, HW, C)
    grid = (pl.cdiv(N, TN),)

    kernel = functools.partial(head_kernel, inv_hw=1.0 / HW)
    out = pl.pallas_call(
        kernel,
        out_shape=jax.ShapeDtypeStruct((N, L_pad), jnp.float32),
        grid_spec=pltpu.PrefetchScalarGridSpec(
            num_scalar_prefetch=0,
            grid=grid,
            in_specs=[
                pl.BlockSpec((TN, HW, C), lambda i: (i, 0, 0)),      # feat tile (pipelined)
                pl.BlockSpec((C, HIDDEN), lambda i: (0, 0)),         # w1 (loop-invariant)
                pl.BlockSpec((1, HIDDEN), lambda i: (0, 0)),         # b1
                pl.BlockSpec((HIDDEN, L_pad), lambda i: (0, 0)),     # w2
                pl.BlockSpec((1, L_pad), lambda i: (0, 0)),          # b2
            ],
            out_specs=pl.BlockSpec((TN, L_pad), lambda i: (i, 0)),
        ),
        compiler_params=pltpu.CompilerParams(
            dimension_semantics=("parallel",),     # shard batch tiles across TCs (v7x)
            vmem_limit_bytes=48 * 1024 * 1024,     # fits budgeted tiles on v5e/v6e/v7x
        ),
    )(feat, w1, b1, w2, b2)

    return out[:, :num_layers]


def make_params(key, num_layers=2):
    ks = jax.random.split(key, 11)
    p = {
        # BatchNorm1d(2048) running stats / affine (non-trivial so folding is exercised)
        "bn1_gamma": 1.0 + 0.1 * jax.random.normal(ks[0], (NUM_FEATURES,), jnp.float32),
        "bn1_beta": 0.1 * jax.random.normal(ks[1], (NUM_FEATURES,), jnp.float32),
        "bn1_mean": 0.1 * jax.random.normal(ks[2], (NUM_FEATURES,), jnp.float32),
        "bn1_var": 1.0 + 0.1 * jax.random.uniform(ks[3], (NUM_FEATURES,), jnp.float32),
        # Linear(2048, 512, bias=False) -- stored (in, out), i.e. transposed vs. PyTorch
        "w1": (jax.random.normal(ks[4], (NUM_FEATURES, HIDDEN), jnp.float32)
               * (1.0 / np.sqrt(NUM_FEATURES))),
        # BatchNorm1d(512)
        "bn2_gamma": 1.0 + 0.1 * jax.random.normal(ks[5], (HIDDEN,), jnp.float32),
        "bn2_beta": 0.1 * jax.random.normal(ks[6], (HIDDEN,), jnp.float32),
        "bn2_mean": 0.1 * jax.random.normal(ks[7], (HIDDEN,), jnp.float32),
        "bn2_var": 1.0 + 0.1 * jax.random.uniform(ks[8], (HIDDEN,), jnp.float32),
        # Linear(512, num_layers) -- stored (in, out) plus bias
        "w2": (jax.random.normal(ks[9], (HIDDEN, num_layers), jnp.float32)
               * (1.0 / np.sqrt(HIDDEN))),
        "b2": jax.random.normal(ks[10], (num_layers,), jnp.float32) * 0.01,
    }
    return p


def reference_head(feat_nhwc, params):
    # Pure-JAX f32 reference (unfolded BN, mean pool), mirrors the PyTorch head in eval mode.
    x = feat_nhwc.astype(jnp.float32)
    pooled = jnp.mean(x, axis=(1, 2))                                   # (N, C)
    x = ((pooled - params["bn1_mean"]) / jnp.sqrt(params["bn1_var"] + BN_EPS)
         * params["bn1_gamma"] + params["bn1_beta"])
    h = jnp.maximum(x @ params["w1"], 0.0)
    h = ((h - params["bn2_mean"]) / jnp.sqrt(params["bn2_var"] + BN_EPS)
         * params["bn2_gamma"] + params["bn2_beta"])
    return h @ params["w2"] + params["b2"]


if __name__ == "__main__":
    key = jax.random.PRNGKey(0)
    k_feat_a, k_feat_b, k_param = jax.random.split(key, 3)
    params = make_params(k_param, num_layers=2)

    # Case 1: tiny batch (single full-extent block), channels-last bf16 feature map
    # as the backbone would emit it: (N=2, H=W=4, C=2048).
    feat_a = jax.random.normal(k_feat_a, (2, 4, 4, NUM_FEATURES),
                               jnp.float32).astype(jnp.bfloat16)
    out_a = jax.block_until_ready(classifier_head(feat_a, params))
    ref_a = jax.block_until_ready(reference_head(feat_a, params))
    np.testing.assert_allclose(np.asarray(out_a), np.asarray(ref_a), rtol=2e-2, atol=2e-2)

    # Case 2: ragged batch (N=10 -> TN=8, grid=2 with masked trailing block, no jnp.pad).
    feat_b = jax.random.normal(k_feat_b, (10, 2, 2, NUM_FEATURES),
                               jnp.float32).astype(jnp.bfloat16)
    out_b = jax.block_until_ready(classifier_head(feat_b, params))
    ref_b = jax.block_until_ready(reference_head(feat_b, params))
    np.testing.assert_allclose(np.asarray(out_b), np.asarray(ref_b), rtol=2e-2, atol=2e-2)

    print("KERNEL_OK")
</pallas_src>

<mosaic_0001>
module attributes {stable_mosaic.version = 11 : i64} {
  func.func @head_kernel(%arg0: i32, %arg1: memref<2x16x2048xbf16, #tpu.memory_space<vmem>>, %arg2: memref<2048x512xbf16, #tpu.memory_space<vmem>>, %arg3: memref<1x512xf32, #tpu.memory_space<vmem>>, %arg4: memref<512x128xbf16, #tpu.memory_space<vmem>>, %arg5: memref<1x128xf32, #tpu.memory_space<vmem>>, %arg6: memref<2x128xf32, #tpu.memory_space<vmem>>) attributes {dimension_semantics = [#tpu.dimension_semantics<parallel>], iteration_bounds = array<i64: 1>, scalar_prefetch = 0 : i64, scratch_operands = 0 : i64, tpu.core_type = #tpu.core_type<tc>, window_params = [{transform_indices = @transform_0, window_bounds = array<i64: 2, 16, 2048>}, {pipeline_mode = #tpu.pipeline_mode<synchronous>, transform_indices = @transform_1, window_bounds = array<i64: 2048, 512>}, {pipeline_mode = #tpu.pipeline_mode<synchronous>, transform_indices = @transform_2, window_bounds = array<i64: 1, 512>}, {pipeline_mode = #tpu.pipeline_mode<synchronous>, transform_indices = @transform_3, window_bounds = array<i64: 512, 128>}, {pipeline_mode = #tpu.pipeline_mode<synchronous>, transform_indices = @transform_4, window_bounds = array<i64: 1, 128>}, {transform_indices = @transform_5, window_bounds = array<i64: 2, 128>}]} {
    %c0 = arith.constant 0 : index
    %c0_0 = arith.constant 0 : index
    %c0_1 = arith.constant 0 : index
    %0 = vector.load %arg1[%c0, %c0_0, %c0_1] : memref<2x16x2048xbf16, #tpu.memory_space<vmem>>, vector<2x16x2048xbf16>
    %1 = arith.extf %0 : vector<2x16x2048xbf16> to vector<2x16x2048xf32>
    %cst = arith.constant dense<0.000000e+00> : vector<2x2048xf32>
    %2 = vector.multi_reduction <add>, %1, %cst [1] : vector<2x16x2048xf32> to vector<2x2048xf32>
    %cst_2 = arith.constant 6.250000e-02 : f32
    %3 = vector.broadcast %cst_2 : f32 to vector<2x2048xf32>
    %4 = arith.mulf %2, %3 : vector<2x2048xf32>
    %5 = arith.truncf %4 : vector<2x2048xf32> to vector<2x2048xbf16>
    %c0_3 = arith.constant 0 : index
    %c0_4 = arith.constant 0 : index
    %6 = vector.load %arg2[%c0_3, %c0_4] : memref<2048x512xbf16, #tpu.memory_space<vmem>>, vector<2048x512xbf16>
    %cst_5 = arith.constant dense<0.000000e+00> : vector<2x512xf32>
    %7 = tpu.matmul %5, %6, %cst_5 {dimension_numbers = #tpu.dot_dimension_numbers<[1], [0], [0], [1], [0, 0, 1, 1], [], []>} : vector<2x2048xbf16>, vector<2048x512xbf16>, vector<2x512xf32> -> vector<2x512xf32>
    %c0_6 = arith.constant 0 : index
    %c0_7 = arith.constant 0 : index
    %8 = vector.load %arg3[%c0_6, %c0_7] : memref<1x512xf32, #tpu.memory_space<vmem>>, vector<1x512xf32>
    %9 = vector.broadcast %8 : vector<1x512xf32> to vector<2x512xf32>
    %10 = arith.addf %7, %9 : vector<2x512xf32>
    %cst_8 = arith.constant 0.000000e+00 : f32
    %11 = vector.broadcast %cst_8 : f32 to vector<2x512xf32>
    %12 = arith.maximumf %10, %11 : vector<2x512xf32>
    %13 = arith.truncf %12 : vector<2x512xf32> to vector<2x512xbf16>
    %c0_9 = arith.constant 0 : index
    %c0_10 = arith.constant 0 : index
    %14 = vector.load %arg4[%c0_9, %c0_10] : memref<512x128xbf16, #tpu.memory_space<vmem>>, vector<512x128xbf16>
    %cst_11 = arith.constant dense<0.000000e+00> : vector<2x128xf32>
    %15 = tpu.matmul %13, %14, %cst_11 {dimension_numbers = #tpu.dot_dimension_numbers<[1], [0], [0], [1], [0, 0, 1, 1], [], []>} : vector<2x512xbf16>, vector<512x128xbf16>, vector<2x128xf32> -> vector<2x128xf32>
    %c0_12 = arith.constant 0 : index
    %c0_13 = arith.constant 0 : index
    %16 = vector.load %arg5[%c0_12, %c0_13] : memref<1x128xf32, #tpu.memory_space<vmem>>, vector<1x128xf32>
    %17 = vector.broadcast %16 : vector<1x128xf32> to vector<2x128xf32>
    %18 = arith.addf %15, %17 : vector<2x128xf32>
    %c0_14 = arith.constant 0 : index
    %c0_15 = arith.constant 0 : index
    %19 = vector.load %arg6[%c0_14, %c0_15] : memref<2x128xf32, #tpu.memory_space<vmem>>, vector<2x128xf32>
    tpu.vector_store %arg6[%c0_14, %c0_15], %18 {strides = array<i32>} : memref<2x128xf32, #tpu.memory_space<vmem>>, vector<2x128xf32>,
    return
  }
  func.func @transform_0(%arg0: i32) -> (i32, i32, i32) {
    %c0_i32 = arith.constant 0 : i32
    %c0_i32_0 = arith.constant 0 : i32
    %c0_i32_1 = arith.constant 0 : i32
    return %arg0, %c0_i32, %c0_i32_0 : i32, i32, i32
  }
  func.func @transform_1(%arg0: i32) -> (i32, i32) {
    %c0_i32 = arith.constant 0 : i32
    %c0_i32_0 = arith.constant 0 : i32
    %c0_i32_1 = arith.constant 0 : i32
    return %c0_i32, %c0_i32_0 : i32, i32
  }
  func.func @transform_2(%arg0: i32) -> (i32, i32) {
    %c0_i32 = arith.constant 0 : i32
    %c0_i32_0 = arith.constant 0 : i32
    %c0_i32_1 = arith.constant 0 : i32
    return %c0_i32, %c0_i32_0 : i32, i32
  }
  func.func @transform_3(%arg0: i32) -> (i32, i32) {
    %c0_i32 = arith.constant 0 : i32
    %c0_i32_0 = arith.constant 0 : i32
    %c0_i32_1 = arith.constant 0 : i32
    return %c0_i32, %c0_i32_0 : i32, i32
  }
  func.func @transform_4(%arg0: i32) -> (i32, i32) {
    %c0_i32 = arith.constant 0 : i32
    %c0_i32_0 = arith.constant 0 : i32
    %c0_i32_1 = arith.constant 0 : i32
    return %c0_i32, %c0_i32_0 : i32, i32
  }
  func.func @transform_5(%arg0: i32) -> (i32, i32) {
    %c0_i32 = arith.constant 0 : i32
    %c0_i32_0 = arith.constant 0 : i32
    return %arg0, %c0_i32 : i32, i32
  }
}

</mosaic_0001>

<bundles_post_ra>
// kernel: tpu_custom_call.1
= control target key start
LH: loop header
LB: loop body
LE: loop exit
PB: predicated region body
PF: predicated region fallthrough
CT: control target
= control target key end

     0   :  { %10 = vsyncpa [#allocation3], 0  ;;  %s6467_s0 = inlined_call_operand.hbm [shape: bf16[2,16,2048], index: 0, kind: input, shape index: {}]   ;;  %s6468_s1 = inlined_call_operand.hbm [shape: bf16[2048,512], index: 1, kind: input, shape index: {}]   ;;  %s6469_s2 = inlined_call_operand.hbm [shape: f32[1,512], index: 2, kind: input, shape index: {}]   ;;  %s6470_s3 = inlined_call_operand.hbm [shape: bf16[512,128], index: 3, kind: input, shape index: {}]   ;;  %s6471_s4 = inlined_call_operand.hbm [shape: f32[1,128], index: 4, kind: input, shape index: {}]   ;;  %s6472_s5 = inlined_call_operand.hbm [shape: f32[2,128], index: 5, kind: output, shape index: {}]  }
   0x1   :  { %11 = vsyncpa [#allocation6], 0 }
   0x2   :  { %12 = vsyncpa [#allocation9], 0 }
   0x3   :  { %13 = vsyncpa [#allocation4], 0  ;;  %s6231_s18 = smov [#allocation5]  }
   0x4   :  { %s31_s19 = sshll.u32 %s6231_s18, 4  ;;  %s32_s19 = int_to_ptr.vmem [resolvable:$true] %s31_s19 }
   0x5   :  { %s6111_s20 = scalar_lea.vmem %s32_s19, 65536  ;;  %p6116_p1 = scmp.lt.s32.totalorder %s32_s19, %s32_s19 }
   0x6   :  { %p6112_p0 = scmp.ne.s32.totalorder %s32_s19, %s6111_s20  ;;  %p6117_p2 = scmp.lt.s32.totalorder %s6111_s20, %s6111_s20 }
   0x8   :  { %p6118_p3 = por %p6117_p2, %p6116_p1 }
   0xa   :  { %p6119_p4 = pnand %p6118_p3, %p6112_p0 }
   0xc   :  { %6122 = shalt.err (!%p6119_p4)
}
   0xd   :  { %s6232_s21 = smov 256   ;;  %s6233_s22 = smov 16  }
   0xe   :  { %37 = dma.hbm_to_vmem [thread:$0]  %s6468_s1, 65536, %s32_s19, [#allocation6], %s6232_s21, %s6232_s21, %s6233_s22  }
   0xf   :  { %s6234_s25 = smov [#allocation8]   ;;  %s6235_s27 = smov [#allocation2]  }
  0x10   :  { %s53_s26 = sshll.u32 %s6234_s25, 4  ;;  %s19_s28 = sshll.u32 %s6235_s27, 4  ;;  %s54_s26 = int_to_ptr.vmem [resolvable:$true] %s53_s26  ;;  %s20_s28 = int_to_ptr.vmem [resolvable:$true] %s19_s28 }
  0x11   :  { %s6131_s29 = scalar_lea.vmem %s54_s26, 4096  ;;  %p6136_p6 = scmp.lt.s32.totalorder %s54_s26, %s54_s26 }
  0x12   :  { %p6132_p5 = scmp.ne.s32.totalorder %s54_s26, %s6131_s29  ;;  %p6137_p7 = scmp.lt.s32.totalorder %s6131_s29, %s6131_s29 }
  0x14   :  { %p6138_p8 = por %p6137_p7, %p6136_p6 }
  0x16   :  { %p6139_p9 = pnand %p6138_p8, %p6132_p5 }
  0x18   :  { %6142 = shalt.err (!%p6139_p9)
}
  0x19   :  { %s6236_s30 = smov 64   ;;  %s6237_s6 = smov 4  }
  0x1a   :  { %59 = dma.hbm_to_vmem [thread:$0]  %s6470_s3, 4096, %s54_s26, [#allocation9], %s6236_s30, %s6236_s30, %s6237_s6  }
  0x1b   :  { %s6151_s1 = scalar_lea.vmem %s20_s28, 4096  ;;  %p6156_p11 = scmp.lt.s32.totalorder %s20_s28, %s20_s28 }
  0x1c   :  { %p6152_p10 = scmp.ne.s32.totalorder %s20_s28, %s6151_s1  ;;  %p6157_p12 = scmp.lt.s32.totalorder %s6151_s1, %s6151_s1 }
  0x1e   :  { %p6158_p13 = por %p6157_p12, %p6156_p11 }
  0x20   :  { %p6159_p0 = pnand %p6158_p13, %p6152_p10 }
  0x22   :  { %6162 = shalt.err (!%p6159_p0)
}
  0x23   :  { %s6238_s9 = smov 1024   ;;  %s6239_s12 = smov [#allocation7]  }
  0x24   :  { %25 = dma.hbm_to_vmem [thread:$0]  %s6467_s0, 4096, %s20_s28, [#allocation3], %s6238_s9, %s6238_s9, %s6236_s30  }
  0x25   :  { %s44_s13 = sshll.u32 %s6239_s12, 4  ;;  %s6240_s14 = smov [#allocation10]   ;;  %s45_s13 = int_to_ptr.vmem [resolvable:$true] %s44_s13 }
  0x26   :  { %s66_s15 = sshll.u32 %s6240_s14, 4  ;;  %s6171_s3 = scalar_lea.vmem %s45_s13, 64  ;;  %s67_s15 = int_to_ptr.vmem [resolvable:$true] %s66_s15 }
  0x27   :  { %p6172_p1 = scmp.ne.s32.totalorder %s45_s13, %s6171_s3  ;;  %p6176_p2 = scmp.lt.s32.totalorder %s45_s13, %s45_s13 }
  0x28   :  { %p6177_p3 = scmp.lt.s32.totalorder %s6171_s3, %s6171_s3 }
  0x2a   :  { %p6178_p4 = por %p6177_p3, %p6176_p2 }
  0x2c   :  { %p6179_p5 = pnand %p6178_p4, %p6172_p1 }
  0x2e   :  { %6182 = shalt.err (!%p6179_p5)
}
  0x2f   :  { %47 = dma.hbm_to_vmem [thread:$0]  %s6469_s2, 64, %s45_s13, [#allocation6]  }
  0x30   :  { %s6191_s18 = scalar_lea.vmem %s67_s15, 16  ;;  %s6195_s0 = scalar_lea.vmem %s67_s15, 32 }
  0x31   :  { %p6192_p6 = scmp.ne.s32.totalorder %s67_s15, %s6191_s18  ;;  %p6196_p7 = scmp.lt.s32.totalorder %s67_s15, %s67_s15 }
  0x32   :  { %p6197_p8 = scmp.lt.s32.totalorder %s6195_s0, %s6191_s18 }
  0x34   :  { %p6198_p9 = por %p6197_p8, %p6196_p7 }
  0x36   :  { %p6199_p10 = pnand %p6198_p9, %p6192_p6 }
  0x38   :  { %6202 = shalt.err (!%p6199_p10)
}
  0x39   :  { %69 = dma.hbm_to_vmem [thread:$0]  %s6471_s4, 16, %s67_s15, [#allocation9]  }
  0x3a   :  { %6223 = dma.done.wait [#allocation3], 4096  }
  0x3b   :  { %6224 = vsyncadd [#allocation3], 4294963200 }
  0x3c   :  { %6225 = dma.done.wait [#allocation6], 65600  }
  0x3d   :  { %6226 = vsyncadd [#allocation6], 4294901696 }
  0x3e   :  { %6227 = dma.done.wait [#allocation9], 4112  }
  0x3f   :  { %6228 = vsyncadd [#allocation9], 4294963184  ;;  %v5302_v0 = vld [vmem:[#allocation5 + $0xe4] ss:$16 sps:$4 sm:$0xff]   ;;  %v5306_v2 = vld [vmem:[#allocation5 + $0xe0] ss:$16 sps:$4 sm:$0xff]  }
  0x40   :  { %v5304_v1 = vld [vmem:[#allocation5 + $0x2e4] ss:$16 sps:$4 sm:$0xff]   ;;  %3677 = vmatprep.subr.bf16.mxu0 %v5302_v0  ;;  %v5307_v3 = vld [vmem:[#allocation5 + $0x2e0] ss:$16 sps:$4 sm:$0xff]   ;;  %v87_v60 = vld [vmem:[#allocation2 + $0x8] sm:$0xff]  ;;  %vm1068_vm0 = vcmask 1041409  }
  0x41   :  { %3718 = vmatprep.subr.bf16.mxu1 %v5304_v1  ;;  %v5308_v4 = vld [vmem:[#allocation5 + $0xc4] ss:$16 sps:$4 sm:$0xff]   ;;  %3678 = vmatpush1.bf16.msra.mxu0 %v5306_v2  ;;  %v5312_v6 = vld [vmem:[#allocation5 + $0xc0] ss:$16 sps:$4 sm:$0xff]   ;;  %v95_v61 = vld [vmem:[#allocation2 + $0x48] sm:$0xff]  ;;  %v120_v2 = vunpack.c.l.bf16 %v87_v60  ;;  %s6241_s2 = smov [#allocation11]  }
  0x42   :  { %3719 = vmatpush1.bf16.msra.mxu1 %v5307_v3  ;;  %v5310_v5 = vld [vmem:[#allocation5 + $0x2c4] ss:$16 sps:$4 sm:$0xff]   ;;  %3679 = vmatprep.subr.bf16.mxu0 %v5308_v4  ;;  %v5313_v7 = vld [vmem:[#allocation5 + $0x2c0] ss:$16 sps:$4 sm:$0xff]   ;;  %v103_v62 = vld [vmem:[#allocation2 + $0x88] sm:$0xff]  ;;  %v121_v3 = vunpack.c.h.bf16 %v87_v60  ;;  %s4691_s4 = sshll.u32 %s6241_s2, 4  ;;  %s4692_s4 = int_to_ptr.vmem [resolvable:$true] %s4691_s4 }
  0x43   :  { %3720 = vmatprep.subr.bf16.mxu1 %v5310_v5  ;;  %v5314_v8 = vld [vmem:[#allocation5 + $0xa4] ss:$16 sps:$4 sm:$0xff]   ;;  %v5318_v10 = vld [vmem:[#allocation5 + $0xa0] ss:$16 sps:$4 sm:$0xff]   ;;  %v111_v1 = vld [vmem:[#allocation2 + $0xc8] sm:$0xff]  ;;  %v136_v5 = vunpack.c.l.bf16 %v95_v61  ;;  %s6203_s21 = scalar_lea.vmem %s4692_s4, 32  ;;  %p6208_p12 = scmp.lt.s32.totalorder %s4692_s4, %s4692_s4 }
  0x44   :  { %v5316_v9 = vld [vmem:[#allocation5 + $0x2a4] ss:$16 sps:$4 sm:$0xff]   ;;  %v5319_v11 = vld [vmem:[#allocation5 + $0x2a0] ss:$16 sps:$4 sm:$0xff]   ;;  %p6204_p11 = scmp.ne.s32.totalorder %s4692_s4, %s6203_s21  ;;  %p6209_p13 = scmp.lt.s32.totalorder %s6203_s21, %s6203_s21 }
  0x45   :  { %3680 = vmatpush1.bf16.msra.mxu0 %v5312_v6  ;;  %v5320_v12 = vld [vmem:[#allocation5 + $0x84] ss:$16 sps:$4 sm:$0xff]   ;;  %v5324_v14 = vld [vmem:[#allocation5 + $0x80] ss:$16 sps:$4 sm:$0xff]   ;;  %v137_v6 = vunpack.c.h.bf16 %v95_v61 }
  0x46   :  { %3721 = vmatpush1.bf16.msra.mxu1 %v5313_v7  ;;  %3681 = vmatprep.subr.bf16.mxu0 %v5314_v8  ;;  %v5322_v13 = vld [vmem:[#allocation5 + $0x284] ss:$16 sps:$4 sm:$0xff]   ;;  %v5325_v15 = vld [vmem:[#allocation5 + $0x280] ss:$16 sps:$4 sm:$0xff]   ;;  %v152_v7 = vunpack.c.l.bf16 %v103_v62  ;;  %p6210_p0 = por %p6209_p13, %p6208_p12 }
  0x47   :  { %3722 = vmatprep.subr.bf16.mxu1 %v5316_v9  ;;  %v5326_v16 = vld [vmem:[#allocation5 + $0x64] ss:$16 sps:$4 sm:$0xff]   ;;  %v5330_v18 = vld [vmem:[#allocation5 + $0x60] ss:$16 sps:$4 sm:$0xff]  }
  0x48   :  { %v5328_v17 = vld [vmem:[#allocation5 + $0x264] ss:$16 sps:$4 sm:$0xff]   ;;  %v5331_v19 = vld [vmem:[#allocation5 + $0x260] ss:$16 sps:$4 sm:$0xff]   ;;  %p6211_p1 = pnand %p6210_p0, %p6204_p11 }
  0x49   :  { %3682 = vmatpush1.bf16.msra.mxu0 %v5318_v10  ;;  %v5332_v20 = vld [vmem:[#allocation5 + $0x44] ss:$16 sps:$4 sm:$0xff]   ;;  %v5336_v22 = vld [vmem:[#allocation5 + $0x40] ss:$16 sps:$4 sm:$0xff]  }
  0x4a   :  { %3723 = vmatpush1.bf16.msra.mxu1 %v5319_v11  ;;  %3683 = vmatprep.subr.bf16.mxu0 %v5320_v12  ;;  %v5334_v21 = vld [vmem:[#allocation5 + $0x244] ss:$16 sps:$4 sm:$0xff]   ;;  %v5337_v23 = vld [vmem:[#allocation5 + $0x240] ss:$16 sps:$4 sm:$0xff]   ;;  %v153_v11 = vunpack.c.h.bf16 %v103_v62  ;;  %v168_v12 = vunpack.c.l.bf16 %v111_v1 }
  0x4b   :  { %3724 = vmatprep.subr.bf16.mxu1 %v5322_v13  ;;  %v5338_v24 = vld [vmem:[#allocation5 + $0x24] ss:$16 sps:$4 sm:$0xff]   ;;  %v5342_v26 = vld [vmem:[#allocation5 + $0x20] ss:$16 sps:$4 sm:$0xff]   ;;  %v169_v13 = vunpack.c.h.bf16 %v111_v1 }
  0x4c   :  { %v5340_v25 = vld [vmem:[#allocation5 + $0x224] ss:$16 sps:$4 sm:$0xff]   ;;  %v5343_v27 = vld [vmem:[#allocation5 + $0x220] ss:$16 sps:$4 sm:$0xff]  }
  0x4d   :  { %3684 = vmatpush1.bf16.msra.mxu0 %v5324_v14  ;;  %v5344_v28 = vld [vmem:[#allocation5 + $0x4] ss:$16 sps:$4 sm:$0xff]   ;;  %v5348_v30 = vld [vmem:[#allocation5] ss:$16 sps:$4 sm:$0xff]  }
  0x4e   :  { %3725 = vmatpush1.bf16.msra.mxu1 %v5325_v15  ;;  %3685 = vmatprep.subr.bf16.mxu0 %v5326_v16  ;;  %v5346_v29 = vld [vmem:[#allocation5 + $0x204] ss:$16 sps:$4 sm:$0xff]   ;;  %v5349_v31 = vld [vmem:[#allocation5 + $0x200] ss:$16 sps:$4 sm:$0xff]   ;;  %v203_v16 = vadd.f32 %v137_v6, %v121_v3 }
  0x4f   :  { %3726 = vmatprep.subr.bf16.mxu1 %v5328_v17  ;;  %v5350_v32 = vld [vmem:[#allocation5 + $0x1e4] ss:$16 sps:$4 sm:$0xff]   ;;  %v5354_v34 = vld [vmem:[#allocation5 + $0x1e0] ss:$16 sps:$4 sm:$0xff]  }
  0x50   :  { %v5352_v33 = vld [vmem:[#allocation5 + $0x3e4] ss:$16 sps:$4 sm:$0xff]   ;;  %v5355_v35 = vld [vmem:[#allocation5 + $0x3e0] ss:$16 sps:$4 sm:$0xff]  }
  0x51   :  { %3686 = vmatpush1.bf16.msra.mxu0 %v5330_v18  ;;  %v5356_v36 = vld [vmem:[#allocation5 + $0x1c4] ss:$16 sps:$4 sm:$0xff]   ;;  %v5360_v38 = vld [vmem:[#allocation5 + $0x1c0] ss:$16 sps:$4 sm:$0xff]  }
  0x52   :  { %3727 = vmatpush1.bf16.msra.mxu1 %v5331_v19  ;;  %3687 = vmatprep.subr.bf16.mxu0 %v5332_v20  ;;  %v5358_v37 = vld [vmem:[#allocation5 + $0x3c4] ss:$16 sps:$4 sm:$0xff]   ;;  %v5361_v39 = vld [vmem:[#allocation5 + $0x3c0] ss:$16 sps:$4 sm:$0xff]  }
  0x53   :  { %3728 = vmatprep.subr.bf16.mxu1 %v5334_v21  ;;  %v5362_v40 = vld [vmem:[#allocation5 + $0x1a4] ss:$16 sps:$4 sm:$0xff]   ;;  %v5366_v42 = vld [vmem:[#allocation5 + $0x1a0] ss:$16 sps:$4 sm:$0xff]   ;;  %v315_v21 = vadd.f32 %v169_v13, %v153_v11 }
  0x54   :  { %v5364_v41 = vld [vmem:[#allocation5 + $0x3a4] ss:$16 sps:$4 sm:$0xff]   ;;  %v5367_v43 = vld [vmem:[#allocation5 + $0x3a0] ss:$16 sps:$4 sm:$0xff]  }
  0x55   :  { %3688 = vmatpush1.bf16.msra.mxu0 %v5336_v22  ;;  %v5368_v44 = vld [vmem:[#allocation5 + $0x184] ss:$16 sps:$4 sm:$0xff]   ;;  %v5372_v46 = vld [vmem:[#allocation5 + $0x180] ss:$16 sps:$4 sm:$0xff]   ;;  %v196_v22 = vadd.f32 %v136_v5, %v120_v2 }
  0x56   :  { %3729 = vmatpush1.bf16.msra.mxu1 %v5337_v23  ;;  %3689 = vmatprep.subr.bf16.mxu0 %v5338_v24  ;;  %v5370_v45 = vld [vmem:[#allocation5 + $0x384] ss:$16 sps:$4 sm:$0xff]   ;;  %v5373_v47 = vld [vmem:[#allocation5 + $0x380] ss:$16 sps:$4 sm:$0xff]   ;;  %v308_v23 = vadd.f32 %v168_v12, %v152_v7 }
  0x57   :  { %3730 = vmatprep.subr.bf16.mxu1 %v5340_v25  ;;  %v86_v48 = vld [vmem:[#allocation2] sm:$0xff]  ;;  %v204_v25 = vrot.slane %v203_v16, 4 }
  0x58   :  { %v5374_v49 = vld [vmem:[#allocation5 + $0x164] ss:$16 sps:$4 sm:$0xff]   ;;  %v118_v54 = vunpack.c.l.bf16 %v86_v48  ;;  %v119_v55 = vunpack.c.h.bf16 %v86_v48  ;;  %v5378_v8 = vld [vmem:[#allocation5 + $0x160] ss:$16 sps:$4 sm:$0xff]  }
  0x59   :  { %3690 = vmatpush1.bf16.msra.mxu0 %v5342_v26  ;;  %v5376_v50 = vld [vmem:[#allocation5 + $0x364] ss:$16 sps:$4 sm:$0xff]   ;;  %v5379_v9 = vld [vmem:[#allocation5 + $0x360] ss:$16 sps:$4 sm:$0xff]  }
  0x5a   :  { %3731 = vmatpush1.bf16.msra.mxu1 %v5343_v27  ;;  %3691 = vmatprep.subr.bf16.mxu0 %v5344_v28  ;;  %v94_v51 = vld [vmem:[#allocation2 + $0x40] sm:$0xff] }
  0x5b   :  { %3732 = vmatprep.subr.bf16.mxu1 %v5346_v29  ;;  %v102_v52 = vld [vmem:[#allocation2 + $0x80] sm:$0xff]  ;;  %v134_v56 = vunpack.c.l.bf16 %v94_v51  ;;  %v135_v57 = vunpack.c.h.bf16 %v94_v51  ;;  %v316_v29 = vrot.slane %v315_v21, 4 }
  0x5c   :  { %v110_v53 = vld [vmem:[#allocation2 + $0xc0] sm:$0xff]  ;;  %v150_v58 = vunpack.c.l.bf16 %v102_v52  ;;  %v151_v59 = vunpack.c.h.bf16 %v102_v52 }
  0x5d   :  { %3692 = vmatpush1.bf16.msra.mxu0 %v5348_v30  ;;  %v166_v63 = vunpack.c.l.bf16 %v110_v53  ;;  %v167_v0 = vunpack.c.h.bf16 %v110_v53  ;;  %v189_v4 = vadd.f32 %v135_v57, %v119_v55  ;;  %v5380_v14 = vld [vmem:[#allocation5 + $0x144] ss:$16 sps:$4 sm:$0xff]   ;;  %v182_v17 = vadd.f32 %v134_v56, %v118_v54  ;;  %v5390_v52 = vld [vmem:[#allocation5 + $0x120] ss:$16 sps:$4 sm:$0xff]  }
  0x5e   :  { %3733 = vmatpush1.bf16.msra.mxu1 %v5349_v31  ;;  %3693 = vmatprep.subr.bf16.mxu0 %v5350_v32  ;;  %v5382_v19 = vld [vmem:[#allocation5 + $0x344] ss:$16 sps:$4 sm:$0xff]   ;;  %v197_v30 = vrot.slane %v196_v22, 4  ;;  %v309_v31 = vrot.slane %v308_v23, 4  ;;  %v5384_v32 = vld [vmem:[#allocation5 + $0x140] ss:$16 sps:$4 sm:$0xff]  }
  0x5f   :  { %3734 = vmatprep.subr.bf16.mxu1 %v5352_v33  ;;  %v301_v10 = vadd.f32 %v167_v0, %v151_v59  ;;  %v190_v15 = vrot.slane %v189_v4, 4  ;;  %v294_v18 = vadd.f32 %v166_v63, %v150_v58  ;;  %v183_v26 = vrot.slane %v182_v17, 4  ;;  %v5385_v33 = vld [vmem:[#allocation5 + $0x340] ss:$16 sps:$4 sm:$0xff]   ;;  %v5392_v58 = vld [vmem:[#allocation5 + $0x104] ss:$16 sps:$4 sm:$0xff]  }
  0x60   :  { %v5391_v53 = vld [vmem:[#allocation5 + $0x320] ss:$16 sps:$4 sm:$0xff]   ;;  %v5394_v59 = vld [vmem:[#allocation5 + $0x304] ss:$16 sps:$4 sm:$0xff]  }
  0x61   :  { %3694 = vmatpush2.bf16.msra.mxu0 %v5354_v34  ;;  %v302_v20 = vrot.slane %v301_v10, 4  ;;  %v191_v24 = vadd.f32 %v190_v15, %v189_v4  ;;  %v295_v27 = vrot.slane %v294_v18, 4  ;;  %v5396_v4 = vld [vmem:[#allocation5 + $0x100] ss:$16 sps:$4 sm:$0xff]  }
  0x62   :  { %3735 = vmatpush2.bf16.msra.mxu1 %v5355_v35  ;;  %3695 = vmatprep.subr.bf16.mxu0 %v5356_v36  ;;  %v205_v35 = vadd.f32 %v204_v25, %v203_v16  ;;  %v184_v36 = vadd.f32 %v183_v26, %v182_v17 }
  0x63   :  { %3736 = vmatprep.subr.bf16.mxu1 %v5358_v37  ;;  %v303_v28 = vadd.f32 %v302_v20, %v301_v10  ;;  %v192_v34 = vrot.slane %v191_v24, 2  ;;  %v296_v37 = vadd.f32 %v295_v27, %v294_v18  ;;  %v5400_v18 = vld [vmem:[#allocation5 + $0x4e4] ss:$16 sps:$4 sm:$0xff]  }
  0x65   :  { %3696 = vmatpush2.bf16.msra.mxu0 %v5360_v38  ;;  %v5386_v38 = vld [vmem:[#allocation5 + $0x124] ss:$16 sps:$4 sm:$0xff]  }
  0x66   :  { %3737 = vmatpush2.bf16.msra.mxu1 %v5361_v39  ;;  %3697 = vmatprep.subr.bf16.mxu0 %v5362_v40  ;;  %v5388_v39 = vld [vmem:[#allocation5 + $0x324] ss:$16 sps:$4 sm:$0xff]   ;;  %v304_v40 = vrot.slane %v303_v28, 2 }
  0x67   :  { %3738 = vmatprep.subr.bf16.mxu1 %v5364_v41  ;;  %v317_v41 = vadd.f32 %v316_v29, %v315_v21 }
  0x68   :  { %v305_v48 = vadd.f32 %v304_v40, %v303_v28 }
  0x69   :  { %3698 = vmatpush2.bf16.msra.mxu0 %v5366_v42  ;;  %v198_v42 = vadd.f32 %v197_v30, %v196_v22 }
  0x6a   :  { %3739 = vmatpush2.bf16.msra.mxu1 %v5367_v43  ;;  %3699 = vmatprep.subr.bf16.mxu0 %v5368_v44  ;;  %v310_v43 = vadd.f32 %v309_v31, %v308_v23  ;;  %v193_v44 = vadd.f32 %v192_v34, %v191_v24  ;;  %v306_v60 = vrot.slane %v305_v48, 1 }
  0x6b   :  { %3740 = vmatprep.subr.bf16.mxu1 %v5370_v45  ;;  %v206_v45 = vrot.slane %v205_v35, 2 }
  0x6c   :  { %v311_v51 = vrot.slane %v310_v43, 2  ;;  %v194_v54 = vrot.slane %v193_v44, 1  ;;  %v307_v5 = vadd.f32 %v306_v60, %v305_v48  ;;  %v5413_v60 = vld [vmem:[#allocation5 + $0x6a0] ss:$16 sps:$4 sm:$0xff]  }
  0x6d   :  { %3700 = vmatpush2.bf16.msra.mxu0 %v5372_v46  ;;  %v185_v46 = vrot.slane %v184_v36, 2  ;;  %v207_v55 = vadd.f32 %v206_v45, %v205_v35  ;;  %v5398_v45 = vld [vmem:[#allocation5 + $0x4e0] ss:$16 sps:$4 sm:$0xff]  }
  0x6e   :  { %3741 = vmatpush2.bf16.msra.mxu1 %v5373_v47  ;;  %3701 = vmatprep.subr.bf16.mxu0 %v5374_v49  ;;  %v297_v47 = vrot.slane %v296_v37, 2  ;;  %v318_v49 = vrot.slane %v317_v41, 2  ;;  %v312_v63 = vadd.f32 %v311_v51, %v310_v43  ;;  %v195_v0 = vadd.f32 %v194_v54, %v193_v44  ;;  %v5404_v54 = vld [vmem:[#allocation5 + $0x4c0] ss:$16 sps:$4 sm:$0xff]  }
  0x6f   :  { %3742 = vmatprep.subr.bf16.mxu1 %v5376_v50  ;;  %v199_v50 = vrot.slane %v198_v42, 2  ;;  %v186_v56 = vadd.f32 %v185_v46, %v184_v36  ;;  %v208_v1 = vrot.slane %v207_v55, 1 }
  0x70   :  { %v298_v57 = vadd.f32 %v297_v47, %v296_v37  ;;  %v319_v61 = vadd.f32 %v318_v49, %v317_v41  ;;  %v407_v10 = vmul.f32 0.0625, %v195_v0  ;;  %v5406_v49 = vld [vmem:[#allocation5 + $0x4c4] ss:$16 sps:$4 sm:$0xff]   ;;  %v5419_v0 = vld [vmem:[#allocation5 + $0x680] ss:$16 sps:$4 sm:$0xff]  }
  0x71   :  { %3702 = vmatpush2.bf16.msra.mxu0 %v5378_v8  ;;  %v200_v62 = vadd.f32 %v199_v50, %v198_v42  ;;  %v187_v2 = vrot.slane %v186_v56, 1  ;;  %v313_v8 = vrot.slane %v312_v63, 1  ;;  %v209_v11 = vadd.f32 %v208_v1, %v207_v55  ;;  %v5412_v55 = vld [vmem:[#allocation5 + $0x4a4] ss:$16 sps:$4 sm:$0xff]  }
  0x72   :  { %3743 = vmatpush2.bf16.msra.mxu1 %v5379_v9  ;;  %3703 = vmatprep.subr.bf16.mxu0 %v5380_v14  ;;  %v299_v3 = vrot.slane %v298_v57, 1  ;;  %v320_v6 = vrot.slane %v319_v61, 1  ;;  %v5397_v9 = vld [vmem:[#allocation5 + $0x300] ss:$16 sps:$4 sm:$0xff]   ;;  %v423_v14 = vmul.f32 0.0625, %v307_v5  ;;  %v439_v20 = vpack.c.bf16 %v407_v10, %v407_v10 }
  0x73   :  { %3744 = vmatprep.subr.bf16.mxu1 %v5382_v19  ;;  %v201_v7 = vrot.slane %v200_v62, 1  ;;  %v188_v12 = vadd.f32 %v187_v2, %v186_v56  ;;  %v314_v17 = vadd.f32 %v313_v8, %v312_v63  ;;  %v5403_v19 = vld [vmem:[#allocation5 + $0x6e4] ss:$16 sps:$4 sm:$0xff]   ;;  %v409_v21 = vmul.f32 0.0625, %v209_v11  ;;  %v5407_v56 = vld [vmem:[#allocation5 + $0x6c0] ss:$16 sps:$4 sm:$0xff]  }
  0x74   :  { %v300_v13 = vadd.f32 %v299_v3, %v298_v57  ;;  %v321_v15 = vadd.f32 %v320_v6, %v319_v61  ;;  %v455_v24 = vpack.c.bf16 %v423_v14, %v423_v14  ;;  %v1037_v28 = vunpack.c.l.b16 %v439_v20  ;;  %v5415_v57 = vld [vmem:[#allocation5 + $0x6a4] ss:$16 sps:$4 sm:$0xff]   ;;  %v5422_v2 = vld [vmem:[#allocation5 + $0x460] ss:$16 sps:$4 sm:$0xff]  }
  0x75   :  { %3704 = vmatpush2.bf16.msra.mxu0 %v5384_v32  ;;  %v202_v16 = vadd.f32 %v201_v7, %v200_v62  ;;  %v406_v22 = vmul.f32 0.0625, %v188_v12  ;;  %v424_v27 = vmul.f32 0.0625, %v314_v17  ;;  %v441_v29 = vpack.c.bf16 %v409_v21, %v409_v21  ;;  %v5421_v61 = vld [vmem:[#allocation5 + $0x684] ss:$16 sps:$4 sm:$0xff]   ;;  %v5416_v62 = vld [vmem:[#allocation5 + $0x480] ss:$16 sps:$4 sm:$0xff]  }
  0x76   :  { %3745 = vmatpush2.bf16.msra.mxu1 %v5385_v33  ;;  %3705 = vmatprep.subr.bf16.mxu0 %v5386_v38  ;;  %v422_v23 = vmul.f32 0.0625, %v300_v13  ;;  %v425_v25 = vmul.f32 0.0625, %v321_v15  ;;  %v1053_v32 = vunpack.c.l.b16 %v455_v24  ;;  %v5424_v63 = vld [vmem:[#allocation5 + $0x464] ss:$16 sps:$4 sm:$0xff]   ;;  %v5428_v6 = vld [vmem:[#allocation5 + $0x440] ss:$16 sps:$4 sm:$0xff]  }
  0x77   :  { %3746 = vmatprep.subr.bf16.mxu1 %v5388_v39  ;;  %v408_v26 = vmul.f32 0.0625, %v202_v16  ;;  %v438_v30 = vpack.c.bf16 %v406_v22, %v406_v22  ;;  %v456_v35 = vpack.c.bf16 %v424_v27, %v424_v27  ;;  %v1039_v36 = vunpack.c.l.b16 %v441_v29  ;;  %v5427_v1 = vld [vmem:[#allocation5 + $0x664] ss:$16 sps:$4 sm:$0xff]   ;;  %v5431_v7 = vld [vmem:[#allocation5 + $0x640] ss:$16 sps:$4 sm:$0xff]   ;;  %v97_v24 = vld [vmem:[#allocation2 + $0x58] sm:$0xff] }
  0x78   :  { %v454_v31 = vpack.c.bf16 %v422_v23, %v422_v23  ;;  %v457_v33 = vpack.c.bf16 %v425_v25, %v425_v25  ;;  %v1070_v39 = vsel %vm1068_vm0, %v1053_v32, %v1037_v28  ;;  %v5430_v3 = vld [vmem:[#allocation5 + $0x444] ss:$16 sps:$4 sm:$0xff]   ;;  %v105_v25 = vld [vmem:[#allocation2 + $0x98] sm:$0xff]  ;;  %v5437_v32 = vld [vmem:[#allocation5 + $0x620] ss:$16 sps:$4 sm:$0xff]  }
  0x79   :  { %3706 = vmatpush2.bf16.msra.mxu0 %v5390_v52  ;;  %v440_v34 = vpack.c.bf16 %v408_v26, %v408_v26  ;;  %v1036_v37 = vunpack.c.l.b16 %v438_v30  ;;  %v1054_v42 = vunpack.c.l.b16 %v456_v35  ;;  %v6288_v43 = vpack.c.b16 %v1070_v39, %v1070_v39  ;;  %v5401_v52 = vld [vmem:[#allocation5 + $0x6e0] ss:$16 sps:$4 sm:$0xff]   ;;  %v5433_v5 = vld [vmem:[#allocation5 + $0x644] ss:$16 sps:$4 sm:$0xff]   ;;  %v113_v26 = vld [vmem:[#allocation2 + $0xd8] sm:$0xff] }
  0x7a   :  { %3747 = vmatpush2.bf16.msra.mxu1 %v5391_v53  ;;  %3707 = vmatprep.subr.bf16.mxu0 %v5392_v58  ;;  %v1052_v38 = vunpack.c.l.b16 %v454_v31  ;;  %v1055_v40 = vunpack.c.l.b16 %v457_v33  ;;  %v5409_v53 = vld [vmem:[#allocation5 + $0x6c4] ss:$16 sps:$4 sm:$0xff]   ;;  %v5410_v58 = vld [vmem:[#allocation5 + $0x4a0] ss:$16 sps:$4 sm:$0xff]   ;;  %v140_v31 = vunpack.c.l.bf16 %v97_v24  ;;  %v156_v35 = vunpack.c.l.bf16 %v105_v25 }
  0x7b   :  { %3748 = vmatprep.subr.bf16.mxu1 %v5394_v59  ;;  %v1038_v41 = vunpack.c.l.b16 %v440_v34  ;;  %3709 = vmatprep.mubr.bf16.mxu0 %v6288_v43  ;;  %v5418_v59 = vld [vmem:[#allocation5 + $0x484] ss:$16 sps:$4 sm:$0xff]   ;;  %v141_v34 = vunpack.c.h.bf16 %v97_v24  ;;  %v172_v39 = vunpack.c.l.bf16 %v113_v26 }
  0x7c   :  { %v1069_v44 = vsel %vm1068_vm0, %v1052_v38, %v1036_v37  ;;  %v1072_v46 = vsel %vm1068_vm0, %v1055_v40, %v1039_v36  ;;  %v5436_v8 = vld [vmem:[#allocation5 + $0x424] ss:$16 sps:$4 sm:$0xff]   ;;  %v157_v36 = vunpack.c.h.bf16 %v105_v25  ;;  %v173_v40 = vunpack.c.h.bf16 %v113_v26 }
  0x7d   :  { %3708 = vmatpush2.bf16.msra.mxu0 %v5396_v4  ;;  %v6292_v47 = vpack.c.b16 %v1069_v44, %v1069_v44  ;;  %v1071_v48 = vsel %vm1068_vm0, %v1054_v42, %v1038_v41  ;;  %v6296_v50 = vpack.c.b16 %v1072_v46, %v1072_v46  ;;  %v5425_v4 = vld [vmem:[#allocation5 + $0x660] ss:$16 sps:$4 sm:$0xff]   ;;  %v5439_v10 = vld [vmem:[#allocation5 + $0x624] ss:$16 sps:$4 sm:$0xff]  }
  0x7e   :  { %3749 = vmatpush2.bf16.msra.mxu1 %v5397_v9  ;;  %3759 = vmatprep.subr.bf16.mxu0 %v5400_v18  ;;  %v6298_v51 = vpack.c.b16 %v1071_v48, %v1071_v48  ;;  %v5434_v9 = vld [vmem:[#allocation5 + $0x420] ss:$16 sps:$4 sm:$0xff]   ;;  %v5442_v27 = vld [vmem:[#allocation5 + $0x404] ss:$16 sps:$4 sm:$0xff]  }
  0x7f   :  { %3800 = vmatprep.subr.bf16.mxu1 %v5403_v19  ;;  %3750 = vmatprep.mubr.bf16.mxu1 %v6296_v50  ;;  %v88_v11 = vld [vmem:[#allocation2 + $0x10] sm:$0xff]  ;;  %v89_v19 = vld [vmem:[#allocation2 + $0x18] sm:$0xff] }
  0x80   :  { %3710 = vmatmul.mubr.bf16.vlgmr.msra.gmra.mxu0 %v6292_v47  ;;  %v96_v12 = vld [vmem:[#allocation2 + $0x50] sm:$0xff]  ;;  %v122_v15 = vunpack.c.l.bf16 %v88_v11  ;;  %v123_v16 = vunpack.c.h.bf16 %v88_v11  ;;  %v124_v29 = vunpack.c.l.bf16 %v89_v19  ;;  %v125_v30 = vunpack.c.h.bf16 %v89_v19 }
  0x81   :  { %3760 = vmatpush1.bf16.msra.mxu0 %v5398_v45  ;;  %3751 = vmatmul.mubr.bf16.vlgmr.msra.gmra.mxu1 %v6298_v51  ;;  %v104_v13 = vld [vmem:[#allocation2 + $0x90] sm:$0xff]  ;;  %v138_v17 = vunpack.c.l.bf16 %v96_v12  ;;  %v139_v18 = vunpack.c.h.bf16 %v96_v12 }
  0x82   :  { %3761 = vmatprep.subr.bf16.mxu0 %v5406_v49  ;;  %3801 = vmatpush1.bf16.msra.mxu1 %v5401_v52  ;;  %v112_v14 = vld [vmem:[#allocation2 + $0xd0] sm:$0xff]  ;;  %v154_v20 = vunpack.c.l.bf16 %v104_v13  ;;  %v155_v21 = vunpack.c.h.bf16 %v104_v13  ;;  %v231_v45 = vadd.f32 %v141_v34, %v125_v30  ;;  %v224_v48 = vadd.f32 %v140_v31, %v124_v29 }
  0x83   :  { %3802 = vmatprep.subr.bf16.mxu1 %v5409_v53  ;;  %v170_v22 = vunpack.c.l.bf16 %v112_v14  ;;  %v171_v23 = vunpack.c.h.bf16 %v112_v14  ;;  %v217_v28 = vadd.f32 %v139_v18, %v123_v16  ;;  %v5445_v37 = vld [vmem:[#allocation5 + $0x604] ss:$16 sps:$4 sm:$0xff]   ;;  %v210_v41 = vadd.f32 %v138_v17, %v122_v15  ;;  %v5440_v42 = vld [vmem:[#allocation5 + $0x400] ss:$16 sps:$4 sm:$0xff]  }
  0x84   :  { %v5448_v49 = vld [vmem:[#allocation5 + $0x5e4] ss:$16 sps:$4 sm:$0xff]   ;;  %v343_v53 = vadd.f32 %v173_v40, %v157_v36  ;;  %v5449_v12 = vld [vmem:[#allocation5 + $0x7e0] ss:$16 sps:$4 sm:$0xff]  }
  0x85   :  { %3762 = vmatpush1.bf16.msra.mxu0 %v5404_v54  ;;  %v329_v33 = vadd.f32 %v171_v23, %v155_v21  ;;  %v218_v38 = vrot.slane %v217_v28, 4  ;;  %v322_v46 = vadd.f32 %v170_v22, %v154_v20  ;;  %v211_v54 = vrot.slane %v210_v41, 4  ;;  %v5457_v17 = vld [vmem:[#allocation5 + $0x7c4] ss:$16 sps:$4 sm:$0xff]   ;;  %v5452_v21 = vld [vmem:[#allocation5 + $0x5c0] ss:$16 sps:$4 sm:$0xff]  }
  0x86   :  { %3763 = vmatprep.subr.bf16.mxu0 %v5412_v55  ;;  %3803 = vmatpush1.bf16.msra.mxu1 %v5407_v56  ;;  %v336_v55 = vadd.f32 %v172_v39, %v156_v35  ;;  %v5443_v56 = vld [vmem:[#allocation5 + $0x600] ss:$16 sps:$4 sm:$0xff]   ;;  %v5460_v26 = vld [vmem:[#allocation5 + $0x5a4] ss:$16 sps:$4 sm:$0xff]  }
  0x87   :  { %3804 = vmatprep.subr.bf16.mxu1 %v5415_v57  ;;  %v330_v44 = vrot.slane %v329_v33, 4  ;;  %v219_v52 = vadd.f32 %v218_v38, %v217_v28  ;;  %v5455_v29 = vld [vmem:[#allocation5 + $0x7c0] ss:$16 sps:$4 sm:$0xff]   ;;  %v5463_v35 = vld [vmem:[#allocation5 + $0x7a4] ss:$16 sps:$4 sm:$0xff]  }
  0x88   :  { %v5458_v30 = vld [vmem:[#allocation5 + $0x5a0] ss:$16 sps:$4 sm:$0xff]  }
  0x89   :  { %3764 = vmatpush1.bf16.msra.mxu0 %v5410_v58  ;;  %v331_v57 = vadd.f32 %v330_v44, %v329_v33  ;;  %v232_v58 = vrot.slane %v231_v45, 4 }
  0x8a   :  { %3765 = vmatprep.subr.bf16.mxu0 %v5418_v59  ;;  %3805 = vmatpush1.bf16.msra.mxu1 %v5413_v60  ;;  %v323_v59 = vrot.slane %v322_v46, 4  ;;  %v225_v60 = vrot.slane %v224_v48, 4 }
  0x8b   :  { %3806 = vmatprep.subr.bf16.mxu1 %v5421_v61  ;;  %v5451_v61 = vld [vmem:[#allocation5 + $0x7e4] ss:$16 sps:$4 sm:$0xff]  }
  0x8d   :  { %3766 = vmatpush1.bf16.msra.mxu0 %v5416_v62  ;;  %v220_v62 = vrot.slane %v219_v52, 2 }
  0x8e   :  { %3767 = vmatprep.subr.bf16.mxu0 %v5424_v63  ;;  %3807 = vmatpush1.bf16.msra.mxu1 %v5419_v0  ;;  %v344_v63 = vrot.slane %v343_v53, 4  ;;  %v212_v0 = vadd.f32 %v211_v54, %v210_v41  ;;  %v5469_v54 = vld [vmem:[#allocation5 + $0x784] ss:$16 sps:$4 sm:$0xff]  }
  0x8f   :  { %3808 = vmatprep.subr.bf16.mxu1 %v5427_v1  ;;  %v337_v1 = vrot.slane %v336_v55, 4 }
  0x91   :  { %3768 = vmatpush1.bf16.msra.mxu0 %v5422_v2  ;;  %v5446_v2 = vld [vmem:[#allocation5 + $0x5e0] ss:$16 sps:$4 sm:$0xff]   ;;  %v338_v11 = vadd.f32 %v337_v1, %v336_v55 }
  0x92   :  { %3769 = vmatprep.subr.bf16.mxu0 %v5430_v3  ;;  %3809 = vmatpush1.bf16.msra.mxu1 %v5425_v4  ;;  %v332_v3 = vrot.slane %v331_v57, 2  ;;  %v233_v4 = vadd.f32 %v232_v58, %v231_v45 }
  0x93   :  { %3810 = vmatprep.subr.bf16.mxu1 %v5433_v5  ;;  %v324_v5 = vadd.f32 %v323_v59, %v322_v46  ;;  %v339_v20 = vrot.slane %v338_v11, 2  ;;  %v5461_v46 = vld [vmem:[#allocation5 + $0x7a0] ss:$16 sps:$4 sm:$0xff]  }
  0x94   :  { %v333_v13 = vadd.f32 %v332_v3, %v331_v57  ;;  %v234_v14 = vrot.slane %v233_v4, 2  ;;  %v5464_v57 = vld [vmem:[#allocation5 + $0x580] ss:$16 sps:$4 sm:$0xff]  }
  0x95   :  { %3770 = vmatpush1.bf16.msra.mxu0 %v5428_v6  ;;  %v226_v6 = vadd.f32 %v225_v60, %v224_v48  ;;  %v325_v15 = vrot.slane %v324_v5, 2  ;;  %v340_v34 = vadd.f32 %v339_v20, %v338_v11  ;;  %v5478_v11 = vld [vmem:[#allocation5 + $0x544] ss:$16 sps:$4 sm:$0xff]  }
  0x96   :  { %3771 = vmatprep.subr.bf16.mxu0 %v5436_v8  ;;  %3811 = vmatpush1.bf16.msra.mxu1 %v5431_v7  ;;  %v5454_v7 = vld [vmem:[#allocation5 + $0x5c4] ss:$16 sps:$4 sm:$0xff]   ;;  %v221_v8 = vadd.f32 %v220_v62, %v219_v52  ;;  %v334_v22 = vrot.slane %v333_v13, 1  ;;  %v235_v23 = vadd.f32 %v234_v14, %v233_v4 }
  0x97   :  { %3812 = vmatprep.subr.bf16.mxu1 %v5439_v10  ;;  %v213_v10 = vrot.slane %v212_v0, 2  ;;  %v227_v16 = vrot.slane %v226_v6, 2  ;;  %v326_v25 = vadd.f32 %v325_v15, %v324_v5  ;;  %v5472_v62 = vld [vmem:[#allocation5 + $0x564] ss:$16 sps:$4 sm:$0xff]  }
  0x98   :  { %v222_v18 = vrot.slane %v221_v8, 1  ;;  %v335_v31 = vadd.f32 %v334_v22, %v333_v13  ;;  %v5475_v5 = vld [vmem:[#allocation5 + $0x764] ss:$16 sps:$4 sm:$0xff]   ;;  %v5473_v13 = vld [vmem:[#allocation5 + $0x760] ss:$16 sps:$4 sm:$0xff]  }
  0x99   :  { %3772 = vmatpush1.bf16.msra.mxu0 %v5434_v9  ;;  %v345_v9 = vadd.f32 %v344_v63, %v343_v53  ;;  %v214_v24 = vadd.f32 %v213_v10, %v212_v0  ;;  %v228_v33 = vadd.f32 %v227_v16, %v226_v6  ;;  %v327_v41 = vrot.slane %v326_v25, 1  ;;  %v5467_v0 = vld [vmem:[#allocation5 + $0x780] ss:$16 sps:$4 sm:$0xff]  }
  0x9a   :  { %3773 = vmatprep.subr.bf16.mxu0 %v5442_v27  ;;  %3813 = vmatpush1.bf16.msra.mxu1 %v5437_v32  ;;  %v223_v27 = vadd.f32 %v222_v18, %v221_v8  ;;  %v236_v32 = vrot.slane %v235_v23, 1  ;;  %v427_v38 = vmul.f32 0.0625, %v335_v31  ;;  %v341_v53 = vrot.slane %v340_v34, 1  ;;  %v5470_v8 = vld [vmem:[#allocation5 + $0x560] ss:$16 sps:$4 sm:$0xff]  }
  0x9b   :  { %3814 = vmatprep.subr.bf16.mxu1 %v5445_v37  ;;  %v346_v19 = vrot.slane %v345_v9, 2  ;;  %v215_v40 = vrot.slane %v214_v24, 1  ;;  %v229_v52 = vrot.slane %v228_v33, 1  ;;  %v5476_v18 = vld [vmem:[#allocation5 + $0x540] ss:$16 sps:$4 sm:$0xff]  }
  0x9c   :  { %v411_v36 = vmul.f32 0.0625, %v223_v27  ;;  %v237_v39 = vadd.f32 %v236_v32, %v235_v23  ;;  %v459_v48 = vpack.c.bf16 %v427_v38, %v427_v38  ;;  %v342_v4 = vadd.f32 %v341_v53, %v340_v34  ;;  %v5479_v22 = vld [vmem:[#allocation5 + $0x740] ss:$16 sps:$4 sm:$0xff]   ;;  %v5511_v53 = vld [vmem:[#allocation5 + $0xaa4] ss:$16 sps:$4 sm:$0xff]  }
  0x9d   :  { %3774 = vmatpush1.bf16.msra.mxu0 %v5440_v42  ;;  %v347_v28 = vadd.f32 %v346_v19, %v345_v9  ;;  %v5466_v42 = vld [vmem:[#allocation5 + $0x584] ss:$16 sps:$4 sm:$0xff]   ;;  %v216_v60 = vadd.f32 %v215_v40, %v214_v24  ;;  %v230_v3 = vadd.f32 %v229_v52, %v228_v33  ;;  %v5488_v34 = vld [vmem:[#allocation5 + $0x500] ss:$16 sps:$4 sm:$0xff]  }
  0x9e   :  { %3775 = vmatprep.subr.bf16.mxu0 %v5448_v49  ;;  %3815 = vmatpush1.bf16.msra.mxu1 %v5443_v56  ;;  %v443_v44 = vpack.c.bf16 %v411_v36, %v411_v36  ;;  %v413_v49 = vmul.f32 0.0625, %v237_v39  ;;  %v1057_v58 = vunpack.c.l.b16 %v459_v48  ;;  %v428_v16 = vmul.f32 0.0625, %v342_v4  ;;  %v5493_v33 = vld [vmem:[#allocation5 + $0x704] ss:$16 sps:$4 sm:$0xff]   ;;  %v5500_v48 = vld [vmem:[#allocation5 + $0x8c0] ss:$16 sps:$4 sm:$0xff]  }
  0x9f   :  { %3816 = vmatprep.subr.bf16.mxu1 %v5451_v61  ;;  %v348_v37 = vrot.slane %v347_v28, 1  ;;  %v328_v61 = vadd.f32 %v327_v41, %v326_v25  ;;  %v410_v9 = vmul.f32 0.0625, %v216_v60  ;;  %v412_v15 = vmul.f32 0.0625, %v230_v3  ;;  %v5487_v25 = vld [vmem:[#allocation5 + $0x724] ss:$16 sps:$4 sm:$0xff]  }
  0xa0   :  { %v1041_v55 = vunpack.c.l.b16 %v443_v44  ;;  %v445_v59 = vpack.c.bf16 %v413_v49, %v413_v49  ;;  %v460_v24 = vpack.c.bf16 %v428_v16, %v428_v16  ;;  %v5496_v36 = vld [vmem:[#allocation5 + $0x8e4] ss:$16 sps:$4 sm:$0xff]   ;;  %v5494_v41 = vld [vmem:[#allocation5 + $0x8e0] ss:$16 sps:$4 sm:$0xff]  }
  0xa1   :  { %3776 = vmatpush2.bf16.msra.mxu0 %v5446_v2  ;;  %v349_v45 = vadd.f32 %v348_v37, %v347_v28  ;;  %v426_v10 = vmul.f32 0.0625, %v328_v61  ;;  %v442_v19 = vpack.c.bf16 %v410_v9, %v410_v9  ;;  %v444_v23 = vpack.c.bf16 %v412_v15, %v412_v15  ;;  %v5491_v37 = vld [vmem:[#allocation5 + $0x700] ss:$16 sps:$4 sm:$0xff]   ;;  %v5499_v40 = vld [vmem:[#allocation5 + $0xae4] ss:$16 sps:$4 sm:$0xff]   ;;  %v6329_v61 = vld [vmem:[#allocation2 + $0x28] sm:$0xff] }
  0xa2   :  { %3777 = vmatprep.subr.bf16.mxu0 %v5454_v7  ;;  %3817 = vmatpush2.bf16.msra.mxu1 %v5449_v12  ;;  %v1074_v1 = vsel %vm1068_vm0, %v1057_v58, %v1041_v55  ;;  %v1043_v2 = vunpack.c.l.b16 %v445_v59  ;;  %v1058_v32 = vunpack.c.l.b16 %v460_v24  ;;  %v5502_v44 = vld [vmem:[#allocation5 + $0x8c4] ss:$16 sps:$4 sm:$0xff]   ;;  %v5503_v49 = vld [vmem:[#allocation5 + $0xac0] ss:$16 sps:$4 sm:$0xff]  }
  0xa3   :  { %3818 = vmatprep.subr.bf16.mxu1 %v5457_v17  ;;  %v429_v56 = vmul.f32 0.0625, %v349_v45  ;;  %v6304_v6 = vpack.c.b16 %v1074_v1, %v1074_v1  ;;  %v5481_v17 = vld [vmem:[#allocation5 + $0x744] ss:$16 sps:$4 sm:$0xff]   ;;  %v458_v20 = vpack.c.bf16 %v426_v10, %v426_v10  ;;  %v1040_v27 = vunpack.c.l.b16 %v442_v19  ;;  %v5497_v45 = vld [vmem:[#allocation5 + $0xae0] ss:$16 sps:$4 sm:$0xff]   ;;  %v6335_v1 = vld [vmem:[#allocation2 + $0xa8] sm:$0xff] }
  0xa4   :  { %v1042_v31 = vunpack.c.l.b16 %v444_v23  ;;  %v5508_v52 = vld [vmem:[#allocation5 + $0x8a4] ss:$16 sps:$4 sm:$0xff]   ;;  %v161_v10 = vunpack.c.h.bf16 %v6335_v1  ;;  %v5512_v15 = vld [vmem:[#allocation5 + $0x880] ss:$16 sps:$4 sm:$0xff]  }
  0xa5   :  { %3778 = vmatpush2.bf16.msra.mxu0 %v5452_v21  ;;  %v461_v63 = vpack.c.bf16 %v429_v56, %v429_v56  ;;  %3791 = vmatprep.mubr.bf16.mxu0 %v6304_v6  ;;  %v5484_v21 = vld [vmem:[#allocation5 + $0x524] ss:$16 sps:$4 sm:$0xff]   ;;  %v1056_v28 = vunpack.c.l.b16 %v458_v20 }
  0xa6   :  { %3779 = vmatprep.subr.bf16.mxu0 %v5460_v26  ;;  %3819 = vmatpush2.bf16.msra.mxu1 %v5455_v29  ;;  %v5482_v26 = vld [vmem:[#allocation5 + $0x520] ss:$16 sps:$4 sm:$0xff]   ;;  %v5490_v29 = vld [vmem:[#allocation5 + $0x504] ss:$16 sps:$4 sm:$0xff]   ;;  %v1075_v38 = vsel %vm1068_vm0, %v1058_v32, %v1042_v31 }
  0xa7   :  { %3820 = vmatprep.subr.bf16.mxu1 %v5463_v35  ;;  %v1059_v7 = vunpack.c.l.b16 %v461_v63  ;;  %v1073_v35 = vsel %vm1068_vm0, %v1056_v28, %v1040_v27  ;;  %v6319_v55 = vld [vmem:[#allocation2 + $0x20] sm:$0xff] }
  0xa8   :  { %v6313_v39 = vpack.c.b16 %v1073_v35, %v1073_v35  ;;  %v6321_v56 = vld [vmem:[#allocation2 + $0x60] sm:$0xff]  ;;  %v127_v59 = vunpack.c.h.bf16 %v6319_v55 }
  0xa9   :  { %3780 = vmatpush2.bf16.msra.mxu0 %v5458_v30  ;;  %v1076_v12 = vsel %vm1068_vm0, %v1059_v7, %v1043_v2  ;;  %v5485_v30 = vld [vmem:[#allocation5 + $0x720] ss:$16 sps:$4 sm:$0xff]   ;;  %v143_v60 = vunpack.c.h.bf16 %v6321_v56  ;;  %v6337_v2 = vld [vmem:[#allocation2 + $0xe8] sm:$0xff]  ;;  %v5514_v3 = vld [vmem:[#allocation5 + $0x884] ss:$16 sps:$4 sm:$0xff]  }
  0xaa   :  { %3781 = vmatprep.subr.bf16.mxu0 %v5466_v42  ;;  %3821 = vmatpush2.bf16.msra.mxu1 %v5461_v46  ;;  %v6308_v14 = vpack.c.b16 %v1076_v12, %v1076_v12  ;;  %v6315_v42 = vpack.c.b16 %v1075_v38, %v1075_v38  ;;  %v5505_v46 = vld [vmem:[#allocation5 + $0xac4] ss:$16 sps:$4 sm:$0xff]   ;;  %v5509_v7 = vld [vmem:[#allocation5 + $0xaa0] ss:$16 sps:$4 sm:$0xff]  }
  0xab   :  { %3822 = vmatprep.subr.bf16.mxu1 %v5469_v54  ;;  %v5506_v54 = vld [vmem:[#allocation5 + $0x8a0] ss:$16 sps:$4 sm:$0xff]   ;;  %v245_v4 = vadd.f32 %v143_v60, %v127_v59  ;;  %v5520_v19 = vld [vmem:[#allocation5 + $0x864] ss:$16 sps:$4 sm:$0xff]  }
  0xac   :  { %3832 = vmatprep.mubr.bf16.mxu1 %v6308_v14  ;;  %v6325_v58 = vld [vmem:[#allocation2 + $0xe0] sm:$0xff] }
  0xad   :  { %3782 = vmatpush2.bf16.msra.mxu0 %v5464_v57  ;;  %v6323_v57 = vld [vmem:[#allocation2 + $0xa0] sm:$0xff]  ;;  %v246_v12 = vrot.slane %v245_v4, 4  ;;  %v174_v31 = vunpack.c.l.bf16 %v6325_v58 }
  0xae   :  { %3783 = vmatprep.subr.bf16.mxu0 %v5472_v62  ;;  %3823 = vmatpush2.bf16.msra.mxu1 %v5467_v0  ;;  %v6331_v62 = vld [vmem:[#allocation2 + $0x68] sm:$0xff]  ;;  %v159_v63 = vunpack.c.h.bf16 %v6323_v57  ;;  %v175_v0 = vunpack.c.h.bf16 %v6325_v58  ;;  %v5523_v24 = vld [vmem:[#allocation5 + $0xa64] ss:$16 sps:$4 sm:$0xff]  }
  0xaf   :  { %3824 = vmatprep.subr.bf16.mxu1 %v5475_v5  ;;  %v129_v5 = vunpack.c.h.bf16 %v6329_v61  ;;  %v145_v9 = vunpack.c.h.bf16 %v6331_v62  ;;  %v247_v20 = vadd.f32 %v246_v12, %v245_v4  ;;  %v5532_v58 = vld [vmem:[#allocation5 + $0x824] ss:$16 sps:$4 sm:$0xff]  }
  0xb1   :  { %3784 = vmatpush2.bf16.msra.mxu0 %v5470_v8  ;;  %v357_v8 = vadd.f32 %v175_v0, %v159_v63  ;;  %v248_v27 = vrot.slane %v247_v20, 2 }
  0xb2   :  { %3785 = vmatprep.subr.bf16.mxu0 %v5478_v11  ;;  %3825 = vmatpush2.bf16.msra.mxu1 %v5473_v13  ;;  %v5517_v11 = vld [vmem:[#allocation5 + $0xa84] ss:$16 sps:$4 sm:$0xff]   ;;  %v177_v13 = vunpack.c.h.bf16 %v6337_v2 }
  0xb3   :  { %3826 = vmatprep.subr.bf16.mxu1 %v5481_v17  ;;  %v358_v16 = vrot.slane %v357_v8, 4  ;;  %v259_v17 = vadd.f32 %v145_v9, %v129_v5  ;;  %v249_v35 = vadd.f32 %v248_v27, %v247_v20  ;;  %v5530_v5 = vld [vmem:[#allocation5 + $0x820] ss:$16 sps:$4 sm:$0xff]   ;;  %v5541_v20 = vld [vmem:[#allocation5 + $0xa04] ss:$16 sps:$4 sm:$0xff]  }
  0xb5   :  { %3786 = vmatpush2.bf16.msra.mxu0 %v5476_v18  ;;  %v5515_v18 = vld [vmem:[#allocation5 + $0xa80] ss:$16 sps:$4 sm:$0xff]   ;;  %v260_v23 = vrot.slane %v259_v17, 4 }
  0xb6   :  { %3787 = vmatprep.subr.bf16.mxu0 %v5484_v21  ;;  %3827 = vmatpush2.bf16.msra.mxu1 %v5479_v22  ;;  %v371_v21 = vadd.f32 %v177_v13, %v161_v10  ;;  %v359_v22 = vadd.f32 %v358_v16, %v357_v8 }
  0xb7   :  { %3828 = vmatprep.subr.bf16.mxu1 %v5487_v25  ;;  %v126_v25 = vunpack.c.l.bf16 %v6319_v55 }
  0xb8   :  { %v372_v28 = vrot.slane %v371_v21, 4  ;;  %v360_v32 = vrot.slane %v359_v22, 2 }
  0xb9   :  { %3788 = vmatpush2.bf16.msra.mxu0 %v5482_v26  ;;  %v142_v26 = vunpack.c.l.bf16 %v6321_v56 }
  0xba   :  { %3789 = vmatprep.subr.bf16.mxu0 %v5490_v29  ;;  %3829 = vmatpush2.bf16.msra.mxu1 %v5485_v30  ;;  %v5518_v29 = vld [vmem:[#allocation5 + $0x860] ss:$16 sps:$4 sm:$0xff]   ;;  %v158_v30 = vunpack.c.l.bf16 %v6323_v57  ;;  %v373_v38 = vadd.f32 %v372_v28, %v371_v21  ;;  %v5544_v28 = vld [vmem:[#allocation5 + $0x9e4] ss:$16 sps:$4 sm:$0xff]  }
  0xbb   :  { %3830 = vmatprep.subr.bf16.mxu1 %v5493_v33  ;;  %v261_v33 = vadd.f32 %v260_v23, %v259_v17  ;;  %v238_v56 = vadd.f32 %v142_v26, %v126_v25  ;;  %v5536_v23 = vld [vmem:[#allocation5 + $0x800] ss:$16 sps:$4 sm:$0xff]  }
  0xbc   :  { %v350_v57 = vadd.f32 %v174_v31, %v158_v30  ;;  %v5539_v30 = vld [vmem:[#allocation5 + $0xa00] ss:$16 sps:$4 sm:$0xff]  }
  0xbd   :  { %3790 = vmatpush2.bf16.msra.mxu0 %v5488_v34  ;;  %v5526_v34 = vld [vmem:[#allocation5 + $0x844] ss:$16 sps:$4 sm:$0xff]   ;;  %v239_v9 = vrot.slane %v238_v56, 4 }
  0xbe   :  { %3841 = vmatprep.subr.bf16.mxu0 %v5496_v36  ;;  %3831 = vmatpush2.bf16.msra.mxu1 %v5491_v37  ;;  %v128_v36 = vunpack.c.l.bf16 %v6329_v61  ;;  %v144_v37 = vunpack.c.l.bf16 %v6331_v62  ;;  %v5527_v61 = vld [vmem:[#allocation5 + $0xa40] ss:$16 sps:$4 sm:$0xff]   ;;  %v351_v10 = vrot.slane %v350_v57, 4 }
  0xbf   :  { %3882 = vmatprep.subr.bf16.mxu1 %v5499_v40  ;;  %v5521_v40 = vld [vmem:[#allocation5 + $0xa60] ss:$16 sps:$4 sm:$0xff]   ;;  %v240_v26 = vadd.f32 %v239_v9, %v238_v56 }
  0xc0   :  { %3792 = vmatmul.mubr.bf16.vlgmr.msra.gmra.mxu0 %v6313_v39  ;;  %v252_v0 = vadd.f32 %v144_v37, %v128_v36  ;;  %v352_v27 = vadd.f32 %v351_v10, %v350_v57  ;;  %v5556_v57 = vld [vmem:[#allocation5 + $0x9a4] ss:$16 sps:$4 sm:$0xff]  }
  0xc1   :  { %3842 = vmatpush1.bf16.msra.mxu0 %v5494_v41  ;;  %3833 = vmatmul.mubr.bf16.vlgmr.msra.gmra.mxu1 %v6315_v42  ;;  %v361_v41 = vadd.f32 %v360_v32, %v359_v22  ;;  %v5568_v10 = vld [vmem:[#allocation5 + $0x964] ss:$16 sps:$4 sm:$0xff]  }
  0xc2   :  { %3843 = vmatprep.subr.bf16.mxu0 %v5502_v44  ;;  %3883 = vmatpush1.bf16.msra.mxu1 %v5497_v45  ;;  %v160_v44 = vunpack.c.l.bf16 %v6335_v1  ;;  %v176_v45 = vunpack.c.l.bf16 %v6337_v2  ;;  %v5535_v2 = vld [vmem:[#allocation5 + $0xa24] ss:$16 sps:$4 sm:$0xff]  }
  0xc3   :  { %3884 = vmatprep.subr.bf16.mxu1 %v5505_v46  ;;  %v262_v46 = vrot.slane %v261_v33, 2 }
  0xc4   :  { %v364_v1 = vadd.f32 %v176_v45, %v160_v44  ;;  %v5550_v44 = vld [vmem:[#allocation5 + $0x9c4] ss:$16 sps:$4 sm:$0xff]  }
  0xc5   :  { %3844 = vmatpush1.bf16.msra.mxu0 %v5500_v48  ;;  %v5529_v48 = vld [vmem:[#allocation5 + $0xa44] ss:$16 sps:$4 sm:$0xff]   ;;  %v263_v55 = vadd.f32 %v262_v46, %v261_v33  ;;  %v5545_v46 = vld [vmem:[#allocation5 + $0xbe0] ss:$16 sps:$4 sm:$0xff]  }
  0xc6   :  { %3845 = vmatprep.subr.bf16.mxu0 %v5508_v52  ;;  %3885 = vmatpush1.bf16.msra.mxu1 %v5503_v49  ;;  %v250_v49 = vrot.slane %v249_v35, 1  ;;  %v374_v52 = vrot.slane %v373_v38, 2 }
  0xc7   :  { %3886 = vmatprep.subr.bf16.mxu1 %v5511_v53  ;;  %v5524_v53 = vld [vmem:[#allocation5 + $0x840] ss:$16 sps:$4 sm:$0xff]   ;;  %v264_v63 = vrot.slane %v263_v55, 1 }
  0xc8   :  { %v251_v59 = vadd.f32 %v250_v49, %v249_v35  ;;  %v375_v60 = vadd.f32 %v374_v52, %v373_v38  ;;  %v5547_v35 = vld [vmem:[#allocation5 + $0xbe4] ss:$16 sps:$4 sm:$0xff]   ;;  %v5542_v38 = vld [vmem:[#allocation5 + $0x9e0] ss:$16 sps:$4 sm:$0xff]  }
  0xc9   :  { %3846 = vmatpush1.bf16.msra.mxu0 %v5506_v54  ;;  %v362_v54 = vrot.slane %v361_v41, 1  ;;  %v265_v8 = vadd.f32 %v264_v63, %v263_v55 }
  0xca   :  { %3847 = vmatprep.subr.bf16.mxu0 %v5514_v3  ;;  %3887 = vmatpush1.bf16.msra.mxu1 %v5509_v7  ;;  %v415_v3 = vmul.f32 0.0625, %v251_v59  ;;  %v376_v4 = vrot.slane %v375_v60, 1 }
  0xcb   :  { %3888 = vmatprep.subr.bf16.mxu1 %v5517_v11  ;;  %v363_v62 = vadd.f32 %v362_v54, %v361_v41  ;;  %v5538_v11 = vld [vmem:[#allocation5 + $0x804] ss:$16 sps:$4 sm:$0xff]   ;;  %v417_v17 = vmul.f32 0.0625, %v265_v8  ;;  %v353_v41 = vrot.slane %v352_v27, 2  ;;  %v5548_v54 = vld [vmem:[#allocation5 + $0x9c0] ss:$16 sps:$4 sm:$0xff]  }
  0xcc   :  { %v447_v12 = vpack.c.bf16 %v415_v3, %v415_v3  ;;  %v377_v13 = vadd.f32 %v376_v4, %v375_v60 }
  0xcd   :  { %3848 = vmatpush1.bf16.msra.mxu0 %v5512_v15  ;;  %v431_v7 = vmul.f32 0.0625, %v363_v62  ;;  %v5533_v15 = vld [vmem:[#allocation5 + $0xa20] ss:$16 sps:$4 sm:$0xff]   ;;  %v449_v25 = vpack.c.bf16 %v417_v17, %v417_v17  ;;  %v354_v56 = vadd.f32 %v353_v41, %v352_v27 }
  0xce   :  { %3849 = vmatprep.subr.bf16.mxu0 %v5520_v19  ;;  %3889 = vmatpush1.bf16.msra.mxu1 %v5515_v18  ;;  %v253_v18 = vrot.slane %v252_v0, 4  ;;  %v365_v19 = vrot.slane %v364_v1, 4  ;;  %v1045_v21 = vunpack.c.l.b16 %v447_v12  ;;  %v433_v22 = vmul.f32 0.0625, %v377_v13  ;;  %v5554_v62 = vld [vmem:[#allocation5 + $0x9a0] ss:$16 sps:$4 sm:$0xff]  }
  0xcf   :  { %3890 = vmatprep.subr.bf16.mxu1 %v5523_v24  ;;  %v463_v16 = vpack.c.bf16 %v431_v7, %v431_v7  ;;  %v1047_v32 = vunpack.c.l.b16 %v449_v25  ;;  %v5560_v7 = vld [vmem:[#allocation5 + $0x980] ss:$16 sps:$4 sm:$0xff]  }
  0xd0   :  { %v254_v33 = vadd.f32 %v253_v18, %v252_v0  ;;  %v355_v0 = vrot.slane %v354_v56, 1  ;;  %v5575_v25 = vld [vmem:[#allocation5 + $0xb40] ss:$16 sps:$4 sm:$0xff]  }
  0xd1   :  { %3850 = vmatpush1.bf16.msra.mxu0 %v5518_v29  ;;  %v1061_v24 = vunpack.c.l.b16 %v463_v16  ;;  %v465_v29 = vpack.c.bf16 %v433_v22, %v433_v22  ;;  %v5566_v16 = vld [vmem:[#allocation5 + $0x960] ss:$16 sps:$4 sm:$0xff]  }
  0xd2   :  { %3851 = vmatprep.subr.bf16.mxu0 %v5526_v34  ;;  %3891 = vmatpush1.bf16.msra.mxu1 %v5521_v40  ;;  %v366_v34 = vadd.f32 %v365_v19, %v364_v1  ;;  %v241_v40 = vrot.slane %v240_v26, 2  ;;  %v255_v49 = vrot.slane %v254_v33, 2  ;;  %v5562_v1 = vld [vmem:[#allocation5 + $0x984] ss:$16 sps:$4 sm:$0xff]   ;;  %v356_v9 = vadd.f32 %v355_v0, %v354_v56 }
  0xd3   :  { %3892 = vmatprep.subr.bf16.mxu1 %v5529_v48  ;;  %v1078_v31 = vsel %vm1068_vm0, %v1061_v24, %v1045_v21  ;;  %v1063_v37 = vunpack.c.l.b16 %v465_v29  ;;  %v5574_v19 = vld [vmem:[#allocation5 + $0x944] ss:$16 sps:$4 sm:$0xff]  }
  0xd4   :  { %v6352_v36 = vpack.c.b16 %v1078_v31, %v1078_v31  ;;  %v367_v52 = vrot.slane %v366_v34, 2  ;;  %v242_v55 = vadd.f32 %v241_v40, %v240_v26  ;;  %v256_v59 = vadd.f32 %v255_v49, %v254_v33  ;;  %v5577_v24 = vld [vmem:[#allocation5 + $0xb44] ss:$16 sps:$4 sm:$0xff]   ;;  %v6369_v40 = vld [vmem:[#allocation2 + $0x38] sm:$0xff] }
  0xd5   :  { %3852 = vmatpush1.bf16.msra.mxu0 %v5524_v53  ;;  %v1080_v45 = vsel %vm1068_vm0, %v1063_v37, %v1047_v32  ;;  %v5553_v53 = vld [vmem:[#allocation5 + $0xbc4] ss:$16 sps:$4 sm:$0xff]   ;;  %v430_v18 = vmul.f32 0.0625, %v356_v9  ;;  %v6377_v49 = vld [vmem:[#allocation2 + $0xf8] sm:$0xff]  ;;  %v133_v56 = vunpack.c.h.bf16 %v6369_v40 }
  0xd6   :  { %3853 = vmatprep.subr.bf16.mxu0 %v5532_v58  ;;  %3893 = vmatpush1.bf16.msra.mxu1 %v5527_v61  ;;  %v6356_v48 = vpack.c.b16 %v1080_v45, %v1080_v45  ;;  %v5551_v58 = vld [vmem:[#allocation5 + $0xbc0] ss:$16 sps:$4 sm:$0xff]   ;;  %v368_v60 = vadd.f32 %v367_v52, %v366_v34  ;;  %v5559_v61 = vld [vmem:[#allocation5 + $0xba4] ss:$16 sps:$4 sm:$0xff]   ;;  %v243_v63 = vrot.slane %v242_v55, 1  ;;  %v257_v3 = vrot.slane %v256_v59, 1 }
  0xd7   :  { %3894 = vmatprep.subr.bf16.mxu1 %v5535_v2  ;;  %3873 = vmatprep.mubr.bf16.mxu0 %v6352_v36  ;;  %v5557_v2 = vld [vmem:[#allocation5 + $0xba0] ss:$16 sps:$4 sm:$0xff]   ;;  %v5580_v26 = vld [vmem:[#allocation5 + $0x924] ss:$16 sps:$4 sm:$0xff]   ;;  %v6373_v45 = vld [vmem:[#allocation2 + $0x78] sm:$0xff] }
  0xd8   :  { %3914 = vmatprep.mubr.bf16.mxu1 %v6356_v48  ;;  %v369_v4 = vrot.slane %v368_v60, 1  ;;  %v244_v8 = vadd.f32 %v243_v63, %v242_v55  ;;  %v258_v12 = vadd.f32 %v257_v3, %v256_v59  ;;  %v5583_v29 = vld [vmem:[#allocation5 + $0xb24] ss:$16 sps:$4 sm:$0xff]   ;;  %v5578_v52 = vld [vmem:[#allocation5 + $0x920] ss:$16 sps:$4 sm:$0xff]   ;;  %v149_v59 = vunpack.c.h.bf16 %v6373_v45 }
  0xd9   :  { %3854 = vmatpush1.bf16.msra.mxu0 %v5530_v5  ;;  %v5565_v5 = vld [vmem:[#allocation5 + $0xb84] ss:$16 sps:$4 sm:$0xff]  }
  0xda   :  { %3855 = vmatprep.subr.bf16.mxu0 %v5538_v11  ;;  %3895 = vmatpush1.bf16.msra.mxu1 %v5533_v15  ;;  %v5563_v11 = vld [vmem:[#allocation5 + $0xb80] ss:$16 sps:$4 sm:$0xff]   ;;  %v370_v13 = vadd.f32 %v369_v4, %v368_v60  ;;  %v5571_v15 = vld [vmem:[#allocation5 + $0xb64] ss:$16 sps:$4 sm:$0xff]   ;;  %v414_v17 = vmul.f32 0.0625, %v244_v8  ;;  %v416_v21 = vmul.f32 0.0625, %v258_v12  ;;  %v287_v4 = vadd.f32 %v149_v59, %v133_v56 }
  0xdb   :  { %3896 = vmatprep.subr.bf16.mxu1 %v5541_v20  ;;  %v5569_v20 = vld [vmem:[#allocation5 + $0xb60] ss:$16 sps:$4 sm:$0xff]  }
  0xdc   :  { %v432_v22 = vmul.f32 0.0625, %v370_v13  ;;  %v446_v27 = vpack.c.bf16 %v414_v17, %v414_v17  ;;  %v6361_v31 = vld [vmem:[#allocation2 + $0x70] sm:$0xff]  ;;  %v448_v32 = vpack.c.bf16 %v416_v21, %v416_v21  ;;  %v288_v12 = vrot.slane %v287_v4, 4 }
  0xdd   :  { %3856 = vmatpush1.bf16.msra.mxu0 %v5536_v23  ;;  %v5572_v23 = vld [vmem:[#allocation5 + $0x940] ss:$16 sps:$4 sm:$0xff]  }
  0xde   :  { %3857 = vmatprep.subr.bf16.mxu0 %v5544_v28  ;;  %3897 = vmatpush1.bf16.msra.mxu1 %v5539_v30  ;;  %v462_v28 = vpack.c.bf16 %v430_v18, %v430_v18  ;;  %v6359_v30 = vld [vmem:[#allocation2 + $0x30] sm:$0xff]  ;;  %v464_v33 = vpack.c.bf16 %v432_v22, %v432_v22  ;;  %v289_v21 = vadd.f32 %v288_v12, %v287_v4 }
  0xdf   :  { %3898 = vmatprep.subr.bf16.mxu1 %v5547_v35  ;;  %v6363_v34 = vld [vmem:[#allocation2 + $0xb0] sm:$0xff]  ;;  %v131_v37 = vunpack.c.h.bf16 %v6359_v30 }
  0xe0   :  { %v6365_v35 = vld [vmem:[#allocation2 + $0xf0] sm:$0xff]  ;;  %v163_v41 = vunpack.c.h.bf16 %v6363_v34  ;;  %v1062_v63 = vunpack.c.l.b16 %v464_v33 }
  0xe1   :  { %3858 = vmatpush2.bf16.msra.mxu0 %v5542_v38  ;;  %v147_v38 = vunpack.c.h.bf16 %v6361_v31  ;;  %v5587_v13 = vld [vmem:[#allocation5 + $0xb00] ss:$16 sps:$4 sm:$0xff]  }
  0xe2   :  { %3859 = vmatprep.subr.bf16.mxu0 %v5550_v44  ;;  %3899 = vmatpush2.bf16.msra.mxu1 %v5545_v46  ;;  %v179_v44 = vunpack.c.h.bf16 %v6365_v35  ;;  %v6375_v46 = vld [vmem:[#allocation2 + $0xb8] sm:$0xff]  ;;  %v5590_v22 = vld [vmem:[#allocation5 + $0xce0] ss:$16 sps:$4 sm:$0xff]  }
  0xe3   :  { %3900 = vmatprep.subr.bf16.mxu1 %v5553_v53  ;;  %v1044_v53 = vunpack.c.l.b16 %v446_v27  ;;  %v273_v55 = vadd.f32 %v147_v38, %v131_v37  ;;  %v165_v60 = vunpack.c.h.bf16 %v6375_v46  ;;  %v5601_v37 = vld [vmem:[#allocation5 + $0xec4] ss:$16 sps:$4 sm:$0xff]   ;;  %v5608_v12 = vld [vmem:[#allocation5 + $0xc80] ss:$16 sps:$4 sm:$0xff]  }
  0xe5   :  { %3860 = vmatpush2.bf16.msra.mxu0 %v5548_v54  ;;  %v1060_v54 = vunpack.c.l.b16 %v462_v28  ;;  %v274_v0 = vrot.slane %v273_v55, 4  ;;  %v290_v28 = vrot.slane %v289_v21, 2 }
  0xe6   :  { %3861 = vmatprep.subr.bf16.mxu0 %v5556_v57  ;;  %3901 = vmatpush2.bf16.msra.mxu1 %v5551_v58  ;;  %v5586_v57 = vld [vmem:[#allocation5 + $0x904] ss:$16 sps:$4 sm:$0xff]   ;;  %v385_v58 = vadd.f32 %v179_v44, %v163_v41  ;;  %v5596_v44 = vld [vmem:[#allocation5 + $0xcc0] ss:$16 sps:$4 sm:$0xff]  }
  0xe7   :  { %3902 = vmatprep.subr.bf16.mxu1 %v5559_v61  ;;  %v5581_v61 = vld [vmem:[#allocation5 + $0xb20] ss:$16 sps:$4 sm:$0xff]   ;;  %v275_v8 = vadd.f32 %v274_v0, %v273_v55  ;;  %v291_v41 = vadd.f32 %v290_v28, %v289_v21  ;;  %v178_v28 = vunpack.c.l.bf16 %v6365_v35  ;;  %v5625_v35 = vld [vmem:[#allocation5 + $0xe44] ss:$16 sps:$4 sm:$0xff]  }
  0xe8   :  { %v386_v3 = vrot.slane %v385_v58, 4 }
  0xe9   :  { %3862 = vmatpush2.bf16.msra.mxu0 %v5554_v62  ;;  %v1046_v62 = vunpack.c.l.b16 %v448_v32  ;;  %v292_v56 = vrot.slane %v291_v41, 1 }
  0xea   :  { %3863 = vmatprep.subr.bf16.mxu0 %v5562_v1  ;;  %3903 = vmatpush2.bf16.msra.mxu1 %v5557_v2  ;;  %v181_v1 = vunpack.c.h.bf16 %v6377_v49  ;;  %v5589_v2 = vld [vmem:[#allocation5 + $0xb04] ss:$16 sps:$4 sm:$0xff]  }
  0xeb   :  { %3904 = vmatprep.subr.bf16.mxu1 %v5565_v5  ;;  %v5584_v5 = vld [vmem:[#allocation5 + $0x900] ss:$16 sps:$4 sm:$0xff]  }
  0xec   :  { %v399_v9 = vadd.f32 %v181_v1, %v165_v60  ;;  %v5607_v60 = vld [vmem:[#allocation5 + $0xea4] ss:$16 sps:$4 sm:$0xff]  }
  0xed   :  { %3864 = vmatpush2.bf16.msra.mxu0 %v5560_v7  ;;  %v1077_v7 = vsel %vm1068_vm0, %v1060_v54, %v1044_v53  ;;  %v5604_v54 = vld [vmem:[#allocation5 + $0xca4] ss:$16 sps:$4 sm:$0xff]  }
  0xee   :  { %3865 = vmatprep.subr.bf16.mxu0 %v5568_v10  ;;  %3905 = vmatpush2.bf16.msra.mxu1 %v5563_v11  ;;  %v5592_v10 = vld [vmem:[#allocation5 + $0xce4] ss:$16 sps:$4 sm:$0xff]   ;;  %v387_v11 = vadd.f32 %v386_v3, %v385_v58  ;;  %v400_v17 = vrot.slane %v399_v9, 4  ;;  %v6385_v18 = vpack.c.b16 %v1077_v7, %v1077_v7 }
  0xef   :  { %3906 = vmatprep.subr.bf16.mxu1 %v5571_v15  ;;  %v1079_v15 = vsel %vm1068_vm0, %v1062_v63, %v1046_v62  ;;  %v293_v62 = vadd.f32 %v292_v56, %v291_v41  ;;  %v5602_v63 = vld [vmem:[#allocation5 + $0xca0] ss:$16 sps:$4 sm:$0xff]  }
  0xf0   :  { %v5620_v41 = vld [vmem:[#allocation5 + $0xc40] ss:$16 sps:$4 sm:$0xff]  }
  0xf1   :  { %3866 = vmatpush2.bf16.msra.mxu0 %v5566_v16  ;;  %v276_v16 = vrot.slane %v275_v8, 2  ;;  %v421_v4 = vmul.f32 0.0625, %v293_v62  ;;  %v5632_v62 = vld [vmem:[#allocation5 + $0xc00] ss:$16 sps:$4 sm:$0xff]  }
  0xf2   :  { %3867 = vmatprep.subr.bf16.mxu0 %v5574_v19  ;;  %3907 = vmatpush2.bf16.msra.mxu1 %v5569_v20  ;;  %v5595_v19 = vld [vmem:[#allocation5 + $0xee4] ss:$16 sps:$4 sm:$0xff]   ;;  %v388_v20 = vrot.slane %v387_v11, 2 }
  0xf3   :  { %3908 = vmatprep.subr.bf16.mxu1 %v5577_v24  ;;  %v401_v24 = vadd.f32 %v400_v17, %v399_v9  ;;  %v5613_v9 = vld [vmem:[#allocation5 + $0xe84] ss:$16 sps:$4 sm:$0xff]  }
  0xf4   :  { %v389_v27 = vadd.f32 %v388_v20, %v387_v11  ;;  %v453_v11 = vpack.c.bf16 %v421_v4, %v421_v4 }
  0xf5   :  { %3868 = vmatpush2.bf16.msra.mxu0 %v5572_v23  ;;  %v277_v23 = vadd.f32 %v276_v16, %v275_v8  ;;  %v402_v33 = vrot.slane %v401_v24, 2 }
  0xf6   :  { %3869 = vmatprep.subr.bf16.mxu0 %v5580_v26  ;;  %3909 = vmatpush2.bf16.msra.mxu1 %v5575_v25  ;;  %v6387_v25 = vpack.c.b16 %v1079_v15, %v1079_v15  ;;  %v5598_v26 = vld [vmem:[#allocation5 + $0xcc4] ss:$16 sps:$4 sm:$0xff]   ;;  %v390_v38 = vrot.slane %v389_v27, 1  ;;  %v1051_v17 = vunpack.c.l.b16 %v453_v11  ;;  %v5641_v11 = vld [vmem:[#allocation5 + $0xfe0] ss:$16 sps:$4 sm:$0xff]  }
  0xf7   :  { %3910 = vmatprep.subr.bf16.mxu1 %v5583_v29  ;;  %v5593_v29 = vld [vmem:[#allocation5 + $0xee0] ss:$16 sps:$4 sm:$0xff]   ;;  %v278_v32 = vrot.slane %v277_v23, 1  ;;  %v403_v53 = vadd.f32 %v402_v33, %v401_v24  ;;  %v5616_v15 = vld [vmem:[#allocation5 + $0xc64] ss:$16 sps:$4 sm:$0xff]  }
  0xf8   :  { %v391_v55 = vadd.f32 %v390_v38, %v389_v27  ;;  %v5614_v24 = vld [vmem:[#allocation5 + $0xc60] ss:$16 sps:$4 sm:$0xff]   ;;  %v162_v27 = vunpack.c.l.bf16 %v6363_v34  ;;  %v148_v38 = vunpack.c.l.bf16 %v6373_v45  ;;  %v180_v34 = vunpack.c.l.bf16 %v6377_v49  ;;  %v5631_v45 = vld [vmem:[#allocation5 + $0xe24] ss:$16 sps:$4 sm:$0xff]  }
  0xf9   :  { %3870 = vmatpush2.bf16.msra.mxu0 %v5578_v52  ;;  %v279_v52 = vadd.f32 %v278_v32, %v277_v23  ;;  %v404_v59 = vrot.slane %v403_v53, 1  ;;  %v130_v23 = vunpack.c.l.bf16 %v6359_v30  ;;  %v5622_v32 = vld [vmem:[#allocation5 + $0xc44] ss:$16 sps:$4 sm:$0xff]   ;;  %v132_v30 = vunpack.c.l.bf16 %v6369_v40 }
  0xfa   :  { %3871 = vmatprep.subr.bf16.mxu0 %v5586_v57  ;;  %3911 = vmatpush2.bf16.msra.mxu1 %v5581_v61  ;;  %v5599_v57 = vld [vmem:[#allocation5 + $0xec0] ss:$16 sps:$4 sm:$0xff]   ;;  %v435_v61 = vmul.f32 0.0625, %v391_v55 }
  0xfb   :  { %3912 = vmatprep.subr.bf16.mxu1 %v5589_v2  ;;  %v419_v58 = vmul.f32 0.0625, %v279_v52  ;;  %v405_v1 = vadd.f32 %v404_v59, %v403_v53  ;;  %v5610_v2 = vld [vmem:[#allocation5 + $0xc84] ss:$16 sps:$4 sm:$0xff]   ;;  %v378_v52 = vadd.f32 %v178_v28, %v162_v27  ;;  %v280_v55 = vadd.f32 %v148_v38, %v132_v30  ;;  %v5650_v27 = vld [vmem:[#allocation5 + $0xda0] ss:$16 sps:$4 sm:$0xff]  }
  0xfc   :  { %v467_v3 = vpack.c.bf16 %v435_v61, %v435_v61  ;;  %v5628_v53 = vld [vmem:[#allocation5 + $0xc24] ss:$16 sps:$4 sm:$0xff]  }
  0xfd   :  { %3872 = vmatpush2.bf16.msra.mxu0 %v5584_v5  ;;  %v451_v0 = vpack.c.bf16 %v419_v58, %v419_v58  ;;  %v5605_v5 = vld [vmem:[#allocation5 + $0xea0] ss:$16 sps:$4 sm:$0xff]   ;;  %v437_v8 = vmul.f32 0.0625, %v405_v1  ;;  %v379_v49 = vrot.slane %v378_v52, 4  ;;  %v281_v59 = vrot.slane %v280_v55, 4 }
  0xfe   :  { %3923 = vmatprep.subr.bf16.mxu0 %v5592_v10  ;;  %3913 = vmatpush2.bf16.msra.mxu1 %v5587_v13  ;;  %v1065_v10 = vunpack.c.l.b16 %v467_v3  ;;  %v5629_v58 = vld [vmem:[#allocation5 + $0xe20] ss:$16 sps:$4 sm:$0xff]   ;;  %v5637_v61 = vld [vmem:[#allocation5 + $0xe04] ss:$16 sps:$4 sm:$0xff]  }
  0xff   :  { %3964 = vmatprep.subr.bf16.mxu1 %v5595_v19  ;;  %v1049_v7 = vunpack.c.l.b16 %v451_v0  ;;  %v469_v13 = vpack.c.bf16 %v437_v8, %v437_v8  ;;  %v5611_v19 = vld [vmem:[#allocation5 + $0xe80] ss:$16 sps:$4 sm:$0xff]   ;;  %v380_v0 = vadd.f32 %v379_v49, %v378_v52  ;;  %v5640_v1 = vld [vmem:[#allocation5 + $0xde4] ss:$16 sps:$4 sm:$0xff]   ;;  %v282_v3 = vadd.f32 %v281_v59, %v280_v55 }
 0x100   :  { %3874 = vmatmul.mubr.bf16.vlgmr.msra.gmra.mxu0 %v6385_v18  ;;  %v5659_v52 = vld [vmem:[#allocation5 + $0xf80] ss:$16 sps:$4 sm:$0xff]   ;;  %v5667_v55 = vld [vmem:[#allocation5 + $0xf64] ss:$16 sps:$4 sm:$0xff]  }
 0x101   :  { %3924 = vmatpush1.bf16.msra.mxu0 %v5590_v22  ;;  %3915 = vmatmul.mubr.bf16.vlgmr.msra.gmra.mxu1 %v6387_v25  ;;  %v1082_v16 = vsel %vm1068_vm0, %v1065_v10, %v1049_v7  ;;  %v1067_v21 = vunpack.c.l.b16 %v469_v13  ;;  %v5619_v22 = vld [vmem:[#allocation5 + $0xe64] ss:$16 sps:$4 sm:$0xff]   ;;  %v5638_v7 = vld [vmem:[#allocation5 + $0xde0] ss:$16 sps:$4 sm:$0xff]  }
 0x102   :  { %3925 = vmatprep.subr.bf16.mxu0 %v5598_v26  ;;  %3965 = vmatpush1.bf16.msra.mxu1 %v5593_v29  ;;  %v6392_v20 = vpack.c.b16 %v1082_v16, %v1082_v16  ;;  %v146_v26 = vunpack.c.l.bf16 %v6361_v31  ;;  %v164_v31 = vunpack.c.l.bf16 %v6375_v46  ;;  %v5626_v46 = vld [vmem:[#allocation5 + $0xc20] ss:$16 sps:$4 sm:$0xff]   ;;  %v5646_v10 = vld [vmem:[#allocation5 + $0xdc4] ss:$16 sps:$4 sm:$0xff]  }
 0x103   :  { %3966 = vmatprep.subr.bf16.mxu1 %v5601_v37  ;;  %v1084_v29 = vsel %vm1068_vm0, %v1067_v21, %v1051_v17  ;;  %v5617_v37 = vld [vmem:[#allocation5 + $0xe60] ss:$16 sps:$4 sm:$0xff]   ;;  %v5652_v21 = vld [vmem:[#allocation5 + $0xda4] ss:$16 sps:$4 sm:$0xff]  }
 0x104   :  { %3955 = vmatprep.mubr.bf16.mxu0 %v6392_v20  ;;  %v6400_v33 = vpack.c.b16 %v1084_v29, %v1084_v29  ;;  %v392_v40 = vadd.f32 %v180_v34, %v164_v31  ;;  %v5644_v16 = vld [vmem:[#allocation5 + $0xdc0] ss:$16 sps:$4 sm:$0xff]   ;;  %v5661_v31 = vld [vmem:[#allocation5 + $0xf84] ss:$16 sps:$4 sm:$0xff]  }
 0x105   :  { %3926 = vmatpush1.bf16.msra.mxu0 %v5596_v44  ;;  %v266_v44 = vadd.f32 %v146_v26, %v130_v23  ;;  %v5655_v26 = vld [vmem:[#allocation5 + $0xfa4] ss:$16 sps:$4 sm:$0xff]   ;;  %v5656_v34 = vld [vmem:[#allocation5 + $0xd80] ss:$16 sps:$4 sm:$0xff]  }
 0x106   :  { %3927 = vmatprep.subr.bf16.mxu0 %v5604_v54  ;;  %3967 = vmatpush1.bf16.msra.mxu1 %v5599_v57  ;;  %v5623_v54 = vld [vmem:[#allocation5 + $0xe40] ss:$16 sps:$4 sm:$0xff]   ;;  %v5634_v57 = vld [vmem:[#allocation5 + $0xc04] ss:$16 sps:$4 sm:$0xff]  }
 0x107   :  { %3968 = vmatprep.subr.bf16.mxu1 %v5607_v60  ;;  %3996 = vmatprep.mubr.bf16.mxu1 %v6400_v33  ;;  %v267_v56 = vrot.slane %v266_v44, 4  ;;  %v393_v60 = vrot.slane %v392_v40, 4  ;;  %v5665_v49 = vld [vmem:[#allocation5 + $0xf60] ss:$16 sps:$4 sm:$0xff]   ;;  %v5673_v59 = vld [vmem:[#allocation5 + $0xf44] ss:$16 sps:$4 sm:$0xff]  }
 0x109   :  { %3928 = vmatpush1.bf16.msra.mxu0 %v5602_v63  ;;  %v268_v63 = vadd.f32 %v267_v56, %v266_v44  ;;  %v394_v4 = vadd.f32 %v393_v60, %v392_v40  ;;  %v5664_v44 = vld [vmem:[#allocation5 + $0xd64] ss:$16 sps:$4 sm:$0xff]   ;;  %v5662_v40 = vld [vmem:[#allocation5 + $0xd60] ss:$16 sps:$4 sm:$0xff]  }
 0x10a   :  { %3929 = vmatprep.subr.bf16.mxu0 %v5610_v2  ;;  %3969 = vmatpush1.bf16.msra.mxu1 %v5605_v5  ;;  %v5635_v2 = vld [vmem:[#allocation5 + $0xe00] ss:$16 sps:$4 sm:$0xff]   ;;  %v5643_v5 = vld [vmem:[#allocation5 + $0xfe4] ss:$16 sps:$4 sm:$0xff]  }
 0x10b   :  { %3970 = vmatprep.subr.bf16.mxu1 %v5613_v9  ;;  %v269_v8 = vrot.slane %v268_v63, 2  ;;  %v381_v9 = vrot.slane %v380_v0, 2  ;;  %v395_v13 = vrot.slane %v394_v4, 2  ;;  %v5670_v56 = vld [vmem:[#allocation5 + $0xd44] ss:$16 sps:$4 sm:$0xff]  }
 0x10c   :  { %v5668_v60 = vld [vmem:[#allocation5 + $0xd40] ss:$16 sps:$4 sm:$0xff]  }
 0x10d   :  { %3930 = vmatpush1.bf16.msra.mxu0 %v5608_v12  ;;  %v283_v12 = vrot.slane %v282_v3, 2  ;;  %v270_v17 = vadd.f32 %v269_v8, %v268_v63 }
 0x10e   :  { %3931 = vmatprep.subr.bf16.mxu0 %v5616_v15  ;;  %3971 = vmatpush1.bf16.msra.mxu1 %v5611_v19  ;;  %v5649_v15 = vld [vmem:[#allocation5 + $0xfc4] ss:$16 sps:$4 sm:$0xff]   ;;  %v382_v19 = vadd.f32 %v381_v9, %v380_v0 }
 0x10f   :  { %3972 = vmatprep.subr.bf16.mxu1 %v5619_v22  ;;  %v5647_v22 = vld [vmem:[#allocation5 + $0xfc0] ss:$16 sps:$4 sm:$0xff]   ;;  %v284_v23 = vadd.f32 %v283_v12, %v282_v3  ;;  %v271_v28 = vrot.slane %v270_v17, 1  ;;  %v5676_v0 = vld [vmem:[#allocation5 + $0xd24] ss:$16 sps:$4 sm:$0xff]  }
 0x110   :  { %v383_v29 = vrot.slane %v382_v19, 1 }
 0x111   :  { %3932 = vmatpush1.bf16.msra.mxu0 %v5614_v24  ;;  %v396_v24 = vadd.f32 %v395_v13, %v394_v4  ;;  %v285_v30 = vrot.slane %v284_v23, 1  ;;  %v5679_v4 = vld [vmem:[#allocation5 + $0xf24] ss:$16 sps:$4 sm:$0xff]  }
 0x112   :  { %3933 = vmatprep.subr.bf16.mxu0 %v5622_v32  ;;  %3973 = vmatpush1.bf16.msra.mxu1 %v5617_v37  ;;  %v5658_v32 = vld [vmem:[#allocation5 + $0xd84] ss:$16 sps:$4 sm:$0xff]   ;;  %v5653_v37 = vld [vmem:[#allocation5 + $0xfa0] ss:$16 sps:$4 sm:$0xff]  }
 0x113   :  { %3974 = vmatprep.subr.bf16.mxu1 %v5625_v35  ;;  %v397_v38 = vrot.slane %v396_v24, 1  ;;  %v272_v35 = vadd.f32 %v271_v28, %v270_v17  ;;  %v982_v17 = vld [vmem:[#allocation7] sm:$0xf]  ;;  %v5691_v28 = vld [vmem:[#allocation5 + $0x2ec] ss:$16 sps:$4 sm:$0xff]  }
 0x115   :  { %3934 = vmatpush1.bf16.msra.mxu0 %v5620_v41  ;;  %v384_v41 = vadd.f32 %v383_v29, %v382_v19 }
 0x116   :  { %3935 = vmatprep.subr.bf16.mxu0 %v5628_v53  ;;  %3975 = vmatpush1.bf16.msra.mxu1 %v5623_v54  ;;  %v286_v53 = vadd.f32 %v285_v30, %v284_v23  ;;  %v398_v54 = vadd.f32 %v397_v38, %v396_v24  ;;  %v5683_v23 = vld [vmem:[#allocation5 + $0xf00] ss:$16 sps:$4 sm:$0xff]   ;;  %v5694_v30 = vld [vmem:[#allocation5 + $0xcc] ss:$16 sps:$4 sm:$0xff]   ;;  %v5689_v38 = vld [vmem:[#allocation5 + $0x2e8] ss:$16 sps:$4 sm:$0xff]  }
 0x117   :  { %3976 = vmatprep.subr.bf16.mxu1 %v5631_v45  ;;  %v418_v45 = vmul.f32 0.0625, %v272_v35  ;;  %v5697_v35 = vld [vmem:[#allocation5 + $0x2cc] ss:$16 sps:$4 sm:$0xff]  }
 0x119   :  { %3936 = vmatpush1.bf16.msra.mxu0 %v5626_v46  ;;  %v434_v46 = vmul.f32 0.0625, %v384_v41 }
 0x11a   :  { %3937 = vmatprep.subr.bf16.mxu0 %v5634_v57  ;;  %3977 = vmatpush1.bf16.msra.mxu1 %v5629_v58  ;;  %v420_v57 = vmul.f32 0.0625, %v286_v53  ;;  %v436_v58 = vmul.f32 0.0625, %v398_v54  ;;  %v5700_v54 = vld [vmem:[#allocation5 + $0xac] ss:$16 sps:$4 sm:$0xff]  }
 0x11b   :  { %3978 = vmatprep.subr.bf16.mxu1 %v5637_v61  ;;  %v984_v61 = vlaneseq  ;;  %v466_v63 = vpack.c.bf16 %v434_v46, %v434_v46 }
 0x11c   :  { %v468_v3 = vpack.c.bf16 %v436_v58, %v436_v58 }
 0x11d   :  { %3938 = vmatpush1.bf16.msra.mxu0 %v5632_v62  ;;  %v450_v62 = vpack.c.bf16 %v418_v45, %v418_v45  ;;  %v1064_v9 = vunpack.c.l.b16 %v466_v63  ;;  %v5695_v45 = vld [vmem:[#allocation5 + $0x2c8] ss:$16 sps:$4 sm:$0xff]   ;;  %v5709_v63 = vld [vmem:[#allocation5 + $0x28c] ss:$16 sps:$4 sm:$0xff]  }
 0x11e   :  { %3939 = vmatprep.subr.bf16.mxu0 %v5640_v1  ;;  %3979 = vmatpush1.bf16.msra.mxu1 %v5635_v2  ;;  %v5671_v1 = vld [vmem:[#allocation5 + $0xf40] ss:$16 sps:$4 sm:$0xff]   ;;  %v452_v2 = vpack.c.bf16 %v420_v57, %v420_v57  ;;  %v1066_v13 = vunpack.c.l.b16 %v468_v3  ;;  %v5710_v3 = vld [vmem:[#allocation5 + $0x68] ss:$16 sps:$4 sm:$0xff]  }
 0x11f   :  { %3980 = vmatprep.subr.bf16.mxu1 %v5643_v5  ;;  %v5674_v5 = vld [vmem:[#allocation5 + $0xd20] ss:$16 sps:$4 sm:$0xff]   ;;  %v1048_v8 = vunpack.c.l.b16 %v450_v62 }
 0x120   :  { %v1050_v12 = vunpack.c.l.b16 %v452_v2  ;;  %v5715_v2 = vld [vmem:[#allocation5 + $0x26c] ss:$16 sps:$4 sm:$0xff]  }
 0x121   :  { %3940 = vmatpush2.bf16.msra.mxu0 %v5638_v7  ;;  %v6407_v7 = vshrl.u32 %v984_v61, 7  ;;  %v5701_v61 = vld [vmem:[#allocation5 + $0x2a8] ss:$16 sps:$4 sm:$0xff]  }
 0x122   :  { %3941 = vmatprep.subr.bf16.mxu0 %v5646_v10  ;;  %3981 = vmatpush2.bf16.msra.mxu1 %v5641_v11  ;;  %v5682_v10 = vld [vmem:[#allocation5 + $0xd04] ss:$16 sps:$4 sm:$0xff]   ;;  %v5677_v11 = vld [vmem:[#allocation5 + $0xf20] ss:$16 sps:$4 sm:$0xff]   ;;  %v1083_v24 = vsel %vm1068_vm0, %v1066_v13, %v1050_v12  ;;  %v5727_v12 = vld [vmem:[#allocation5 + $0x22c] ss:$16 sps:$4 sm:$0xff]  }
 0x123   :  { %3982 = vmatprep.subr.bf16.mxu1 %v5649_v15  ;;  %v5685_v15 = vld [vmem:[#allocation5 + $0xf04] ss:$16 sps:$4 sm:$0xff]   ;;  %v986_v19 = vsub.s32 0, %v6407_v7  ;;  %v5722_v13 = vld [vmem:[#allocation5 + $0x28] ss:$16 sps:$4 sm:$0xff]  }
 0x125   :  { %3942 = vmatpush2.bf16.msra.mxu0 %v5644_v16  ;;  %v5680_v16 = vld [vmem:[#allocation5 + $0xd00] ss:$16 sps:$4 sm:$0xff]   ;;  %v987_v29 = vrot.slane %v982_v17, %v986_v19  ;;  %v5728_v19 = vld [vmem:[#allocation5 + $0x8] ss:$16 sps:$4 sm:$0xff]  }
 0x126   :  { %3943 = vmatprep.subr.bf16.mxu0 %v5652_v21  ;;  %3983 = vmatpush2.bf16.msra.mxu1 %v5647_v22  ;;  %v1081_v21 = vsel %vm1068_vm0, %v1064_v9, %v1048_v8  ;;  %v5688_v22 = vld [vmem:[#allocation5 + $0xec] ss:$16 sps:$4 sm:$0xff]   ;;  %v5716_v9 = vld [vmem:[#allocation5 + $0x48] ss:$16 sps:$4 sm:$0xff]  }
 0x127   :  { %3984 = vmatprep.subr.bf16.mxu1 %v5655_v26  ;;  %v990_v26 = vsub.s32 1, %v6407_v7  ;;  %v5721_v8 = vld [vmem:[#allocation5 + $0x24c] ss:$16 sps:$4 sm:$0xff]  }
 0x129   :  { %3944 = vmatpush2.bf16.msra.mxu0 %v5650_v27  ;;  %v6413_v27 = vpack.c.b16 %v1081_v21, %v1081_v21  ;;  %v5736_v21 = vld [vmem:[#allocation5 + $0x1ec] ss:$16 sps:$4 sm:$0xff]  }
 0x12a   :  { %3945 = vmatprep.subr.bf16.mxu0 %v5658_v32  ;;  %3985 = vmatpush2.bf16.msra.mxu1 %v5653_v37  ;;  %v5686_v32 = vld [vmem:[#allocation5 + $0xe8] ss:$16 sps:$4 sm:$0xff]   ;;  %v6415_v37 = vpack.c.b16 %v1083_v24, %v1083_v24 }
 0x12b   :  { %3986 = vmatprep.subr.bf16.mxu1 %v5661_v31  ;;  %v991_v31 = vrot.slane %v982_v17, %v990_v26  ;;  %v5733_v17 = vld [vmem:[#allocation5 + $0x20c] ss:$16 sps:$4 sm:$0xff]   ;;  %v5734_v24 = vld [vmem:[#allocation5 + $0x1e8] ss:$16 sps:$4 sm:$0xff]  }
 0x12c   :  { %v5742_v26 = vld [vmem:[#allocation5 + $0x1cc] ss:$16 sps:$4 sm:$0xff]  }
 0x12d   :  { %3946 = vmatpush2.bf16.msra.mxu0 %v5656_v34 }
 0x12e   :  { %3947 = vmatprep.subr.bf16.mxu0 %v5664_v44  ;;  %3987 = vmatpush2.bf16.msra.mxu1 %v5659_v52  ;;  %v5692_v44 = vld [vmem:[#allocation5 + $0xc8] ss:$16 sps:$4 sm:$0xff]  }
 0x12f   :  { %3988 = vmatprep.subr.bf16.mxu1 %v5667_v55 }
 0x131   :  { %3948 = vmatpush2.bf16.msra.mxu0 %v5662_v40 }
 0x132   :  { %3949 = vmatprep.subr.bf16.mxu0 %v5670_v56  ;;  %3989 = vmatpush2.bf16.msra.mxu1 %v5665_v49  ;;  %v5703_v49 = vld [vmem:[#allocation5 + $0x2ac] ss:$16 sps:$4 sm:$0xff]  }
 0x133   :  { %3990 = vmatprep.subr.bf16.mxu1 %v5673_v59 }
 0x135   :  { %3950 = vmatpush2.bf16.msra.mxu0 %v5668_v60  ;;  %v5706_v60 = vld [vmem:[#allocation5 + $0x8c] ss:$16 sps:$4 sm:$0xff]  }
 0x136   :  { %3951 = vmatprep.subr.bf16.mxu0 %v5676_v0  ;;  %3991 = vmatpush2.bf16.msra.mxu1 %v5671_v1  ;;  %v5704_v0 = vld [vmem:[#allocation5 + $0x88] ss:$16 sps:$4 sm:$0xff]  }
 0x137   :  { %3992 = vmatprep.subr.bf16.mxu1 %v5679_v4  ;;  %v5707_v1 = vld [vmem:[#allocation5 + $0x288] ss:$16 sps:$4 sm:$0xff]   ;;  %v5718_v4 = vld [vmem:[#allocation5 + $0x4c] ss:$16 sps:$4 sm:$0xff]  }
 0x139   :  { %3952 = vmatpush2.bf16.msra.mxu0 %v5674_v5  ;;  %v5713_v5 = vld [vmem:[#allocation5 + $0x268] ss:$16 sps:$4 sm:$0xff]  }
 0x13a   :  { %3953 = vmatprep.subr.bf16.mxu0 %v5682_v10  ;;  %3993 = vmatpush2.bf16.msra.mxu1 %v5677_v11  ;;  %v5724_v10 = vld [vmem:[#allocation5 + $0x2c] ss:$16 sps:$4 sm:$0xff]   ;;  %v5719_v11 = vld [vmem:[#allocation5 + $0x248] ss:$16 sps:$4 sm:$0xff]  }
 0x13b   :  { %3994 = vmatprep.subr.bf16.mxu1 %v5685_v15  ;;  %v5730_v15 = vld [vmem:[#allocation5 + $0xc] ss:$16 sps:$4 sm:$0xff]  }
 0x13d   :  { %3954 = vmatpush2.bf16.msra.mxu0 %v5680_v16  ;;  %v5725_v16 = vld [vmem:[#allocation5 + $0x228] ss:$16 sps:$4 sm:$0xff]  }
 0x13e   :  { %4005 = vmatprep.subr.bf16.mxu0 %v5688_v22  ;;  %3995 = vmatpush2.bf16.msra.mxu1 %v5683_v23  ;;  %v5731_v22 = vld [vmem:[#allocation5 + $0x208] ss:$16 sps:$4 sm:$0xff]   ;;  %v5739_v23 = vld [vmem:[#allocation5 + $0x3ec] ss:$16 sps:$4 sm:$0xff]  }
 0x13f   :  { %4046 = vmatprep.subr.bf16.mxu1 %v5691_v28  ;;  %v5737_v28 = vld [vmem:[#allocation5 + $0x3e8] ss:$16 sps:$4 sm:$0xff]  }
 0x140   :  { %v3711_v34 = vpop.f32.mrf.mxu0  ;;  %3956 = vmatmul.mubr.bf16.vlgmr.msra.gmra.mxu0 %v6413_v27 }
 0x141   :  { %v3712_v41 = vadd.f32 %v3711_v34, %v987_v29  ;;  %4006 = vmatpush1.bf16.msra.mxu0 %v5686_v32  ;;  %4037 = vmatprep.mubr.bf16.mxu0 %v6288_v43  ;;  %v3752_v52 = vpop.f32.mrf.mxu1  ;;  %v5698_v43 = vld [vmem:[#allocation5 + $0xa8] ss:$16 sps:$4 sm:$0xff]   ;;  %v5745_v29 = vld [vmem:[#allocation5 + $0x3cc] ss:$16 sps:$4 sm:$0xff]  }
 0x142   :  { %3997 = vmatmul.mubr.bf16.vlgmr.msra.gmra.mxu1 %v6415_v37  ;;  %v3713_v53 = vpop.f32.mrf.mxu0  ;;  %4007 = vmatprep.subr.bf16.mxu0 %v5694_v30  ;;  %v5740_v32 = vld [vmem:[#allocation5 + $0x1c8] ss:$16 sps:$4 sm:$0xff]   ;;  %v5748_v30 = vld [vmem:[#allocation5 + $0x1ac] ss:$16 sps:$4 sm:$0xff]  }
 0x143   :  { %v6420_v55 = vadd.f32 %v3752_v52, %v3712_v41  ;;  %4047 = vmatpush1.bf16.msra.mxu1 %v5689_v38  ;;  %v3714_v40 = vadd.f32 %v3713_v53, %v991_v31  ;;  %4078 = vmatprep.mubr.bf16.mxu1 %v6296_v50  ;;  %v3754_v46 = vpop.f32.mrf.mxu1  ;;  %v5712_v50 = vld [vmem:[#allocation5 + $0x6c] ss:$16 sps:$4 sm:$0xff]   ;;  %v5743_v38 = vld [vmem:[#allocation5 + $0x3c8] ss:$16 sps:$4 sm:$0xff]  }
 0x144   :  { %v3715_v56 = vpop.f32.mrf.mxu0  ;;  %4048 = vmatprep.subr.bf16.mxu1 %v5697_v35  ;;  %v5751_v31 = vld [vmem:[#allocation5 + $0x3ac] ss:$16 sps:$4 sm:$0xff]   ;;  %v5746_v34 = vld [vmem:[#allocation5 + $0x1a8] ss:$16 sps:$4 sm:$0xff]  }
 0x145   :  { %v6423_v57 = vadd.f32 %v3754_v46, %v3714_v40  ;;  %4008 = vmatpush1.bf16.msra.mxu0 %v5692_v44  ;;  %v3756_v58 = vpop.f32.mrf.mxu1  ;;  %v5754_v35 = vld [vmem:[#allocation5 + $0x18c] ss:$16 sps:$4 sm:$0xff]   ;;  %v5749_v41 = vld [vmem:[#allocation5 + $0x3a8] ss:$16 sps:$4 sm:$0xff]  }
 0x146   :  { %v3716_v59 = vpop.f32.mrf.mxu0  ;;  %4009 = vmatprep.subr.bf16.mxu0 %v5700_v54  ;;  %v5757_v44 = vld [vmem:[#allocation5 + $0x38c] ss:$16 sps:$4 sm:$0xff]   ;;  %v5752_v52 = vld [vmem:[#allocation5 + $0x188] ss:$16 sps:$4 sm:$0xff]  }
 0x147   :  { %4049 = vmatpush1.bf16.msra.mxu1 %v5695_v45  ;;  %v3757_v62 = vpop.f32.mrf.mxu1  ;;  %v5760_v53 = vld [vmem:[#allocation5 + $0x16c] ss:$16 sps:$4 sm:$0xff]   ;;  %v5755_v54 = vld [vmem:[#allocation5 + $0x388] ss:$16 sps:$4 sm:$0xff]  }
 0x148   :  { %4050 = vmatprep.subr.bf16.mxu1 %v5703_v49  ;;  %v5763_v40 = vld [vmem:[#allocation5 + $0x36c] ss:$16 sps:$4 sm:$0xff]   ;;  %v5758_v45 = vld [vmem:[#allocation5 + $0x168] ss:$16 sps:$4 sm:$0xff]  }
 0x149   :  { %4010 = vmatpush1.bf16.msra.mxu0 %v5698_v43  ;;  %v5766_v46 = vld [vmem:[#allocation5 + $0x14c] ss:$16 sps:$4 sm:$0xff]   ;;  %v5761_v56 = vld [vmem:[#allocation5 + $0x368] ss:$16 sps:$4 sm:$0xff]  }
 0x14a   :  { %4011 = vmatprep.subr.bf16.mxu0 %v5706_v60  ;;  %v5764_v49 = vld [vmem:[#allocation5 + $0x148] ss:$16 sps:$4 sm:$0xff]   ;;  %v5769_v43 = vld [vmem:[#allocation5 + $0x34c] ss:$16 sps:$4 sm:$0xff]  }
 0x14b   :  { %4051 = vmatpush1.bf16.msra.mxu1 %v5701_v61  ;;  %v5772_v58 = vld [vmem:[#allocation5 + $0x12c] ss:$16 sps:$4 sm:$0xff]   ;;  %v5767_v59 = vld [vmem:[#allocation5 + $0x348] ss:$16 sps:$4 sm:$0xff]  }
 0x14c   :  { %4052 = vmatprep.subr.bf16.mxu1 %v5709_v63  ;;  %v5770_v60 = vld [vmem:[#allocation5 + $0x128] ss:$16 sps:$4 sm:$0xff]   ;;  %v5775_v61 = vld [vmem:[#allocation5 + $0x32c] ss:$16 sps:$4 sm:$0xff]  }
 0x14d   :  { %4012 = vmatpush1.bf16.msra.mxu0 %v5704_v0  ;;  %v5778_v62 = vld [vmem:[#allocation5 + $0x10c] ss:$16 sps:$4 sm:$0xff]   ;;  %v5773_v63 = vld [vmem:[#allocation5 + $0x328] ss:$16 sps:$4 sm:$0xff]  }
 0x14e   :  { %4013 = vmatprep.subr.bf16.mxu0 %v5712_v50  ;;  %v5776_v0 = vld [vmem:[#allocation5 + $0x108] ss:$16 sps:$4 sm:$0xff]   ;;  %v5781_v50 = vld [vmem:[#allocation5 + $0x30c] ss:$16 sps:$4 sm:$0xff]  }
 0x14f   :  { %4053 = vmatpush1.bf16.msra.mxu1 %v5707_v1  ;;  %v5784_v1 = vld [vmem:[#allocation5 + $0x4ec] ss:$16 sps:$4 sm:$0xff]  }
 0x150   :  { %4054 = vmatprep.subr.bf16.mxu1 %v5715_v2  ;;  %v5779_v2 = vld [vmem:[#allocation5 + $0x308] ss:$16 sps:$4 sm:$0xff]  }
 0x151   :  { %4014 = vmatpush1.bf16.msra.mxu0 %v5710_v3  ;;  %v5782_v3 = vld [vmem:[#allocation5 + $0x4e8] ss:$16 sps:$4 sm:$0xff]  }
 0x152   :  { %4015 = vmatprep.subr.bf16.mxu0 %v5718_v4  ;;  %v5787_v4 = vld [vmem:[#allocation5 + $0x6ec] ss:$16 sps:$4 sm:$0xff]  }
 0x153   :  { %4055 = vmatpush1.bf16.msra.mxu1 %v5713_v5  ;;  %v5790_v5 = vld [vmem:[#allocation5 + $0x4cc] ss:$16 sps:$4 sm:$0xff]  }
 0x154   :  { %4056 = vmatprep.subr.bf16.mxu1 %v5721_v8  ;;  %v5785_v8 = vld [vmem:[#allocation5 + $0x6e8] ss:$16 sps:$4 sm:$0xff]  }
 0x155   :  { %4016 = vmatpush1.bf16.msra.mxu0 %v5716_v9 }
 0x156   :  { %4017 = vmatprep.subr.bf16.mxu0 %v5724_v10  ;;  %v5788_v10 = vld [vmem:[#allocation5 + $0x4c8] ss:$16 sps:$4 sm:$0xff]  }
 0x157   :  { %4057 = vmatpush1.bf16.msra.mxu1 %v5719_v11  ;;  %v5793_v11 = vld [vmem:[#allocation5 + $0x6cc] ss:$16 sps:$4 sm:$0xff]  }
 0x158   :  { %4058 = vmatprep.subr.bf16.mxu1 %v5727_v12 }
 0x159   :  { %4018 = vmatpush1.bf16.msra.mxu0 %v5722_v13  ;;  %v5791_v13 = vld [vmem:[#allocation5 + $0x6c8] ss:$16 sps:$4 sm:$0xff]  }
 0x15a   :  { %4019 = vmatprep.subr.bf16.mxu0 %v5730_v15  ;;  %v5796_v15 = vld [vmem:[#allocation5 + $0x4ac] ss:$16 sps:$4 sm:$0xff]  }
 0x15b   :  { %4059 = vmatpush1.bf16.msra.mxu1 %v5725_v16 }
 0x15c   :  { %4060 = vmatprep.subr.bf16.mxu1 %v5733_v17 }
 0x15d   :  { %4020 = vmatpush1.bf16.msra.mxu0 %v5728_v19 }
 0x15e   :  { %4021 = vmatprep.subr.bf16.mxu0 %v5736_v21 }
 0x15f   :  { %4061 = vmatpush1.bf16.msra.mxu1 %v5731_v22 }
 0x160   :  { %4062 = vmatprep.subr.bf16.mxu1 %v5739_v23  ;;  %v5799_v23 = vld [vmem:[#allocation5 + $0x6ac] ss:$16 sps:$4 sm:$0xff]  }
 0x161   :  { %4022 = vmatpush2.bf16.msra.mxu0 %v5734_v24 }
 0x162   :  { %4023 = vmatprep.subr.bf16.mxu0 %v5742_v26  ;;  %v5802_v26 = vld [vmem:[#allocation5 + $0x48c] ss:$16 sps:$4 sm:$0xff]  }
 0x163   :  { %4063 = vmatpush2.bf16.msra.mxu1 %v5737_v28 }
 0x164   :  { %4064 = vmatprep.subr.bf16.mxu1 %v5745_v29 }
 0x165   :  { %4024 = vmatpush2.bf16.msra.mxu0 %v5740_v32  ;;  %v5805_v32 = vld [vmem:[#allocation5 + $0x68c] ss:$16 sps:$4 sm:$0xff]  }
 0x166   :  { %4025 = vmatprep.subr.bf16.mxu0 %v5748_v30  ;;  %v5803_v30 = vld [vmem:[#allocation5 + $0x688] ss:$16 sps:$4 sm:$0xff]  }
 0x167   :  { %4065 = vmatpush2.bf16.msra.mxu1 %v5743_v38  ;;  %v5806_v38 = vld [vmem:[#allocation5 + $0x468] ss:$16 sps:$4 sm:$0xff]  }
 0x168   :  { %4066 = vmatprep.subr.bf16.mxu1 %v5751_v31  ;;  %v5811_v31 = vld [vmem:[#allocation5 + $0x66c] ss:$16 sps:$4 sm:$0xff]  }
 0x169   :  { %4026 = vmatpush2.bf16.msra.mxu0 %v5746_v34  ;;  %v5814_v34 = vld [vmem:[#allocation5 + $0x44c] ss:$16 sps:$4 sm:$0xff]  }
 0x16a   :  { %4027 = vmatprep.subr.bf16.mxu0 %v5754_v35  ;;  %v5809_v35 = vld [vmem:[#allocation5 + $0x668] ss:$16 sps:$4 sm:$0xff]  }
 0x16b   :  { %4067 = vmatpush2.bf16.msra.mxu1 %v5749_v41  ;;  %v5812_v41 = vld [vmem:[#allocation5 + $0x448] ss:$16 sps:$4 sm:$0xff]  }
 0x16c   :  { %4068 = vmatprep.subr.bf16.mxu1 %v5757_v44  ;;  %v5817_v44 = vld [vmem:[#allocation5 + $0x64c] ss:$16 sps:$4 sm:$0xff]  }
 0x16d   :  { %4028 = vmatpush2.bf16.msra.mxu0 %v5752_v52  ;;  %v5820_v52 = vld [vmem:[#allocation5 + $0x42c] ss:$16 sps:$4 sm:$0xff]  }
 0x16e   :  { %4029 = vmatprep.subr.bf16.mxu0 %v5760_v53  ;;  %v5815_v53 = vld [vmem:[#allocation5 + $0x648] ss:$16 sps:$4 sm:$0xff]  }
 0x16f   :  { %4069 = vmatpush2.bf16.msra.mxu1 %v5755_v54  ;;  %v5818_v54 = vld [vmem:[#allocation5 + $0x428] ss:$16 sps:$4 sm:$0xff]  }
 0x170   :  { %4070 = vmatprep.subr.bf16.mxu1 %v5763_v40  ;;  %v5823_v40 = vld [vmem:[#allocation5 + $0x62c] ss:$16 sps:$4 sm:$0xff]  }
 0x171   :  { %4030 = vmatpush2.bf16.msra.mxu0 %v5758_v45  ;;  %v5826_v45 = vld [vmem:[#allocation5 + $0x40c] ss:$16 sps:$4 sm:$0xff]  }
 0x172   :  { %4031 = vmatprep.subr.bf16.mxu0 %v5766_v46  ;;  %v5821_v46 = vld [vmem:[#allocation5 + $0x628] ss:$16 sps:$4 sm:$0xff]  }
 0x173   :  { %4071 = vmatpush2.bf16.msra.mxu1 %v5761_v56  ;;  %v5824_v56 = vld [vmem:[#allocation5 + $0x408] ss:$16 sps:$4 sm:$0xff]  }
 0x174   :  { %4072 = vmatprep.subr.bf16.mxu1 %v5769_v43  ;;  %v5832_v43 = vld [vmem:[#allocation5 + $0x5ec] ss:$16 sps:$4 sm:$0xff]  }
 0x175   :  { %4032 = vmatpush2.bf16.msra.mxu0 %v5764_v49  ;;  %v5829_v49 = vld [vmem:[#allocation5 + $0x60c] ss:$16 sps:$4 sm:$0xff]  }
 0x176   :  { %4033 = vmatprep.subr.bf16.mxu0 %v5772_v58  ;;  %v5827_v58 = vld [vmem:[#allocation5 + $0x608] ss:$16 sps:$4 sm:$0xff]  }
 0x177   :  { %4073 = vmatpush2.bf16.msra.mxu1 %v5767_v59  ;;  %v5830_v59 = vld [vmem:[#allocation5 + $0x5e8] ss:$16 sps:$4 sm:$0xff]  }
 0x178   :  { %4074 = vmatprep.subr.bf16.mxu1 %v5775_v61  ;;  %v5838_v61 = vld [vmem:[#allocation5 + $0x5cc] ss:$16 sps:$4 sm:$0xff]  }
 0x179   :  { %4034 = vmatpush2.bf16.msra.mxu0 %v5770_v60  ;;  %v5835_v60 = vld [vmem:[#allocation5 + $0x7ec] ss:$16 sps:$4 sm:$0xff]  }
 0x17a   :  { %4035 = vmatprep.subr.bf16.mxu0 %v5778_v62  ;;  %v5833_v62 = vld [vmem:[#allocation5 + $0x7e8] ss:$16 sps:$4 sm:$0xff]  }
 0x17b   :  { %4075 = vmatpush2.bf16.msra.mxu1 %v5773_v63  ;;  %v5836_v63 = vld [vmem:[#allocation5 + $0x5c8] ss:$16 sps:$4 sm:$0xff]  }
 0x17c   :  { %4076 = vmatprep.subr.bf16.mxu1 %v5781_v50  ;;  %v5844_v50 = vld [vmem:[#allocation5 + $0x5ac] ss:$16 sps:$4 sm:$0xff]  }
 0x17d   :  { %4036 = vmatpush2.bf16.msra.mxu0 %v5776_v0  ;;  %v5841_v0 = vld [vmem:[#allocation5 + $0x7cc] ss:$16 sps:$4 sm:$0xff]  }
 0x17e   :  { %4087 = vmatprep.subr.bf16.mxu0 %v5784_v1  ;;  %v5839_v1 = vld [vmem:[#allocation5 + $0x7c8] ss:$16 sps:$4 sm:$0xff]  }
 0x17f   :  { %4077 = vmatpush2.bf16.msra.mxu1 %v5779_v2  ;;  %v5842_v2 = vld [vmem:[#allocation5 + $0x5a8] ss:$16 sps:$4 sm:$0xff]  }
 0x180   :  { %v3793_v9 = vpop.f32.mrf.mxu0  ;;  %4038 = vmatmul.mubr.bf16.vlgmr.msra.gmra.mxu0 %v6292_v47  ;;  %4128 = vmatprep.subr.bf16.mxu1 %v5787_v4  ;;  %v5850_v4 = vld [vmem:[#allocation5 + $0x58c] ss:$16 sps:$4 sm:$0xff]  }
 0x181   :  { %v3794_v12 = vadd.f32 %v3793_v9, %v6420_v55  ;;  %4088 = vmatpush1.bf16.msra.mxu0 %v5782_v3  ;;  %4119 = vmatprep.mubr.bf16.mxu0 %v6304_v6  ;;  %v3834_v16 = vpop.f32.mrf.mxu1  ;;  %v5794_v55 = vld [vmem:[#allocation5 + $0x4a8] ss:$16 sps:$4 sm:$0xff]   ;;  %v5847_v3 = vld [vmem:[#allocation5 + $0x7ac] ss:$16 sps:$4 sm:$0xff]  }
 0x182   :  { %4079 = vmatmul.mubr.bf16.vlgmr.msra.gmra.mxu1 %v6298_v51  ;;  %v3795_v17 = vpop.f32.mrf.mxu0  ;;  %4089 = vmatprep.subr.bf16.mxu0 %v5790_v5  ;;  %v5797_v6 = vld [vmem:[#allocation5 + $0x6a8] ss:$16 sps:$4 sm:$0xff]   ;;  %v5853_v9 = vld [vmem:[#allocation5 + $0x78c] ss:$16 sps:$4 sm:$0xff]  }
 0x183   :  { %v6429_v19 = vadd.f32 %v3834_v16, %v3794_v12  ;;  %4129 = vmatpush1.bf16.msra.mxu1 %v5785_v8  ;;  %v3796_v47 = vadd.f32 %v3795_v17, %v6423_v57  ;;  %4160 = vmatprep.mubr.bf16.mxu1 %v6308_v14  ;;  %v3836_v21 = vpop.f32.mrf.mxu1  ;;  %v5800_v57 = vld [vmem:[#allocation5 + $0x488] ss:$16 sps:$4 sm:$0xff]   ;;  %v5808_v14 = vld [vmem:[#allocation5 + $0x46c] ss:$16 sps:$4 sm:$0xff]  }
 0x184   :  { %v3797_v22 = vpop.f32.mrf.mxu0  ;;  %4130 = vmatprep.subr.bf16.mxu1 %v5793_v11  ;;  %v5845_v5 = vld [vmem:[#allocation5 + $0x7a8] ss:$16 sps:$4 sm:$0xff]  }
 0x185   :  { %v6433_v24 = vadd.f32 %v3836_v21, %v3796_v47  ;;  %4090 = vmatpush1.bf16.msra.mxu0 %v5788_v10  ;;  %v3838_v51 = vpop.f32.mrf.mxu1  ;;  %v5848_v8 = vld [vmem:[#allocation5 + $0x588] ss:$16 sps:$4 sm:$0xff]   ;;  %v5856_v10 = vld [vmem:[#allocation5 + $0x56c] ss:$16 sps:$4 sm:$0xff]  }
 0x186   :  { %v3798_v28 = vpop.f32.mrf.mxu0  ;;  %4091 = vmatprep.subr.bf16.mxu0 %v5796_v15  ;;  %v5851_v11 = vld [vmem:[#allocation5 + $0x788] ss:$16 sps:$4 sm:$0xff]   ;;  %v5862_v15 = vld [vmem:[#allocation5 + $0x54c] ss:$16 sps:$4 sm:$0xff]  }
 0x187   :  { %4131 = vmatpush1.bf16.msra.mxu1 %v5791_v13  ;;  %v3839_v29 = vpop.f32.mrf.mxu1  ;;  %v5854_v12 = vld [vmem:[#allocation5 + $0x568] ss:$16 sps:$4 sm:$0xff]   ;;  %v5859_v13 = vld [vmem:[#allocation5 + $0x76c] ss:$16 sps:$4 sm:$0xff]  }
 0x188   :  { %4132 = vmatprep.subr.bf16.mxu1 %v5799_v23  ;;  %v5857_v16 = vld [vmem:[#allocation5 + $0x768] ss:$16 sps:$4 sm:$0xff]   ;;  %v5865_v47 = vld [vmem:[#allocation5 + $0x74c] ss:$16 sps:$4 sm:$0xff]  }
 0x189   :  { %4092 = vmatpush1.bf16.msra.mxu0 %v5794_v55  ;;  %v5860_v17 = vld [vmem:[#allocation5 + $0x548] ss:$16 sps:$4 sm:$0xff]   ;;  %v5868_v21 = vld [vmem:[#allocation5 + $0x52c] ss:$16 sps:$4 sm:$0xff]  }
 0x18a   :  { %4093 = vmatprep.subr.bf16.mxu0 %v5802_v26  ;;  %v5863_v22 = vld [vmem:[#allocation5 + $0x748] ss:$16 sps:$4 sm:$0xff]   ;;  %v5871_v23 = vld [vmem:[#allocation5 + $0x72c] ss:$16 sps:$4 sm:$0xff]  }
 0x18b   :  { %4133 = vmatpush1.bf16.msra.mxu1 %v5797_v6  ;;  %v5866_v55 = vld [vmem:[#allocation5 + $0x528] ss:$16 sps:$4 sm:$0xff]   ;;  %v5874_v6 = vld [vmem:[#allocation5 + $0x50c] ss:$16 sps:$4 sm:$0xff]  }
 0x18c   :  { %4134 = vmatprep.subr.bf16.mxu1 %v5805_v32  ;;  %v5869_v26 = vld [vmem:[#allocation5 + $0x728] ss:$16 sps:$4 sm:$0xff]   ;;  %v5877_v51 = vld [vmem:[#allocation5 + $0x70c] ss:$16 sps:$4 sm:$0xff]  }
 0x18d   :  { %4094 = vmatpush1.bf16.msra.mxu0 %v5800_v57  ;;  %v5872_v28 = vld [vmem:[#allocation5 + $0x508] ss:$16 sps:$4 sm:$0xff]   ;;  %v5880_v29 = vld [vmem:[#allocation5 + $0x8ec] ss:$16 sps:$4 sm:$0xff]  }
 0x18e   :  { %4095 = vmatprep.subr.bf16.mxu0 %v5808_v14  ;;  %v5875_v32 = vld [vmem:[#allocation5 + $0x708] ss:$16 sps:$4 sm:$0xff]   ;;  %v5883_v57 = vld [vmem:[#allocation5 + $0xaec] ss:$16 sps:$4 sm:$0xff]  }
 0x18f   :  { %4135 = vmatpush1.bf16.msra.mxu1 %v5803_v30  ;;  %v5878_v14 = vld [vmem:[#allocation5 + $0x8e8] ss:$16 sps:$4 sm:$0xff]   ;;  %v5886_v30 = vld [vmem:[#allocation5 + $0x8cc] ss:$16 sps:$4 sm:$0xff]  }
 0x190   :  { %4136 = vmatprep.subr.bf16.mxu1 %v5811_v31 }
 0x191   :  { %4096 = vmatpush1.bf16.msra.mxu0 %v5806_v38  ;;  %v5881_v38 = vld [vmem:[#allocation5 + $0xae8] ss:$16 sps:$4 sm:$0xff]  }
 0x192   :  { %4097 = vmatprep.subr.bf16.mxu0 %v5814_v34  ;;  %v5889_v34 = vld [vmem:[#allocation5 + $0xacc] ss:$16 sps:$4 sm:$0xff]  }
 0x193   :  { %4137 = vmatpush1.bf16.msra.mxu1 %v5809_v35 }
 0x194   :  { %4138 = vmatprep.subr.bf16.mxu1 %v5817_v44 }
 0x195   :  { %4098 = vmatpush1.bf16.msra.mxu0 %v5812_v41  ;;  %v5884_v41 = vld [vmem:[#allocation5 + $0x8c8] ss:$16 sps:$4 sm:$0xff]  }
 0x196   :  { %4099 = vmatprep.subr.bf16.mxu0 %v5820_v52 }
 0x197   :  { %4139 = vmatpush1.bf16.msra.mxu1 %v5815_v53  ;;  %v5892_v53 = vld [vmem:[#allocation5 + $0x8ac] ss:$16 sps:$4 sm:$0xff]  }
 0x198   :  { %4140 = vmatprep.subr.bf16.mxu1 %v5823_v40 }
 0x199   :  { %4100 = vmatpush1.bf16.msra.mxu0 %v5818_v54 }
 0x19a   :  { %4101 = vmatprep.subr.bf16.mxu0 %v5826_v45 }
 0x19b   :  { %4141 = vmatpush1.bf16.msra.mxu1 %v5821_v46  ;;  %v5895_v46 = vld [vmem:[#allocation5 + $0xaac] ss:$16 sps:$4 sm:$0xff]  }
 0x19c   :  { %4142 = vmatprep.subr.bf16.mxu1 %v5829_v49 }
 0x19d   :  { %4102 = vmatpush1.bf16.msra.mxu0 %v5824_v56 }
 0x19e   :  { %4103 = vmatprep.subr.bf16.mxu0 %v5832_v43  ;;  %v5898_v43 = vld [vmem:[#allocation5 + $0x88c] ss:$16 sps:$4 sm:$0xff]  }
 0x19f   :  { %4143 = vmatpush1.bf16.msra.mxu1 %v5827_v58  ;;  %v5893_v58 = vld [vmem:[#allocation5 + $0xaa8] ss:$16 sps:$4 sm:$0xff]  }
 0x1a0   :  { %4144 = vmatprep.subr.bf16.mxu1 %v5835_v60  ;;  %v5896_v60 = vld [vmem:[#allocation5 + $0x888] ss:$16 sps:$4 sm:$0xff]  }
 0x1a1   :  { %4104 = vmatpush2.bf16.msra.mxu0 %v5830_v59 }
 0x1a2   :  { %4105 = vmatprep.subr.bf16.mxu0 %v5838_v61  ;;  %v5899_v61 = vld [vmem:[#allocation5 + $0xa88] ss:$16 sps:$4 sm:$0xff]  }
 0x1a3   :  { %4145 = vmatpush2.bf16.msra.mxu1 %v5833_v62  ;;  %v5907_v62 = vld [vmem:[#allocation5 + $0xa6c] ss:$16 sps:$4 sm:$0xff]  }
 0x1a4   :  { %4146 = vmatprep.subr.bf16.mxu1 %v5841_v0  ;;  %v5910_v0 = vld [vmem:[#allocation5 + $0x84c] ss:$16 sps:$4 sm:$0xff]  }
 0x1a5   :  { %4106 = vmatpush2.bf16.msra.mxu0 %v5836_v63  ;;  %v5902_v63 = vld [vmem:[#allocation5 + $0x868] ss:$16 sps:$4 sm:$0xff]  }
 0x1a6   :  { %4107 = vmatprep.subr.bf16.mxu0 %v5844_v50  ;;  %v5905_v50 = vld [vmem:[#allocation5 + $0xa68] ss:$16 sps:$4 sm:$0xff]  }
 0x1a7   :  { %4147 = vmatpush2.bf16.msra.mxu1 %v5839_v1  ;;  %v5913_v1 = vld [vmem:[#allocation5 + $0xa4c] ss:$16 sps:$4 sm:$0xff]  }
 0x1a8   :  { %4148 = vmatprep.subr.bf16.mxu1 %v5847_v3  ;;  %v5916_v3 = vld [vmem:[#allocation5 + $0x82c] ss:$16 sps:$4 sm:$0xff]  }
 0x1a9   :  { %4108 = vmatpush2.bf16.msra.mxu0 %v5842_v2  ;;  %v5908_v2 = vld [vmem:[#allocation5 + $0x848] ss:$16 sps:$4 sm:$0xff]  }
 0x1aa   :  { %4109 = vmatprep.subr.bf16.mxu0 %v5850_v4  ;;  %v5911_v4 = vld [vmem:[#allocation5 + $0xa48] ss:$16 sps:$4 sm:$0xff]  }
 0x1ab   :  { %4149 = vmatpush2.bf16.msra.mxu1 %v5845_v5  ;;  %v5919_v5 = vld [vmem:[#allocation5 + $0xa2c] ss:$16 sps:$4 sm:$0xff]  }
 0x1ac   :  { %4150 = vmatprep.subr.bf16.mxu1 %v5853_v9  ;;  %v5922_v9 = vld [vmem:[#allocation5 + $0x80c] ss:$16 sps:$4 sm:$0xff]  }
 0x1ad   :  { %4110 = vmatpush2.bf16.msra.mxu0 %v5848_v8  ;;  %v5914_v8 = vld [vmem:[#allocation5 + $0x828] ss:$16 sps:$4 sm:$0xff]  }
 0x1ae   :  { %4111 = vmatprep.subr.bf16.mxu0 %v5856_v10  ;;  %v5917_v10 = vld [vmem:[#allocation5 + $0xa28] ss:$16 sps:$4 sm:$0xff]  }
 0x1af   :  { %4151 = vmatpush2.bf16.msra.mxu1 %v5851_v11  ;;  %v5925_v11 = vld [vmem:[#allocation5 + $0xa0c] ss:$16 sps:$4 sm:$0xff]  }
 0x1b0   :  { %4152 = vmatprep.subr.bf16.mxu1 %v5859_v13  ;;  %v5928_v13 = vld [vmem:[#allocation5 + $0x9ec] ss:$16 sps:$4 sm:$0xff]  }
 0x1b1   :  { %4112 = vmatpush2.bf16.msra.mxu0 %v5854_v12  ;;  %v5920_v12 = vld [vmem:[#allocation5 + $0x808] ss:$16 sps:$4 sm:$0xff]  }
 0x1b2   :  { %4113 = vmatprep.subr.bf16.mxu0 %v5862_v15  ;;  %v5923_v15 = vld [vmem:[#allocation5 + $0xa08] ss:$16 sps:$4 sm:$0xff]  }
 0x1b3   :  { %4153 = vmatpush2.bf16.msra.mxu1 %v5857_v16  ;;  %v5931_v16 = vld [vmem:[#allocation5 + $0xbec] ss:$16 sps:$4 sm:$0xff]  }
 0x1b4   :  { %4154 = vmatprep.subr.bf16.mxu1 %v5865_v47  ;;  %v5934_v47 = vld [vmem:[#allocation5 + $0x9cc] ss:$16 sps:$4 sm:$0xff]  }
 0x1b5   :  { %4114 = vmatpush2.bf16.msra.mxu0 %v5860_v17  ;;  %v5926_v17 = vld [vmem:[#allocation5 + $0x9e8] ss:$16 sps:$4 sm:$0xff]  }
 0x1b6   :  { %4115 = vmatprep.subr.bf16.mxu0 %v5868_v21  ;;  %v5929_v21 = vld [vmem:[#allocation5 + $0xbe8] ss:$16 sps:$4 sm:$0xff]  }
 0x1b7   :  { %4155 = vmatpush2.bf16.msra.mxu1 %v5863_v22  ;;  %v5937_v22 = vld [vmem:[#allocation5 + $0xbcc] ss:$16 sps:$4 sm:$0xff]  }
 0x1b8   :  { %4156 = vmatprep.subr.bf16.mxu1 %v5871_v23  ;;  %v5940_v23 = vld [vmem:[#allocation5 + $0x9ac] ss:$16 sps:$4 sm:$0xff]  }
 0x1b9   :  { %4116 = vmatpush2.bf16.msra.mxu0 %v5866_v55  ;;  %v5932_v55 = vld [vmem:[#allocation5 + $0x9c8] ss:$16 sps:$4 sm:$0xff]  }
 0x1ba   :  { %4117 = vmatprep.subr.bf16.mxu0 %v5874_v6  ;;  %v5935_v6 = vld [vmem:[#allocation5 + $0xbc8] ss:$16 sps:$4 sm:$0xff]  }
 0x1bb   :  { %4157 = vmatpush2.bf16.msra.mxu1 %v5869_v26  ;;  %v5943_v26 = vld [vmem:[#allocation5 + $0xbac] ss:$16 sps:$4 sm:$0xff]  }
 0x1bc   :  { %4158 = vmatprep.subr.bf16.mxu1 %v5877_v51  ;;  %v5938_v51 = vld [vmem:[#allocation5 + $0x9a8] ss:$16 sps:$4 sm:$0xff]  }
 0x1bd   :  { %4118 = vmatpush2.bf16.msra.mxu0 %v5872_v28  ;;  %v5946_v28 = vld [vmem:[#allocation5 + $0x98c] ss:$16 sps:$4 sm:$0xff]  }
 0x1be   :  { %4169 = vmatprep.subr.bf16.mxu0 %v5880_v29  ;;  %v5941_v29 = vld [vmem:[#allocation5 + $0xba8] ss:$16 sps:$4 sm:$0xff]  }
 0x1bf   :  { %4159 = vmatpush2.bf16.msra.mxu1 %v5875_v32  ;;  %v5949_v32 = vld [vmem:[#allocation5 + $0xb8c] ss:$16 sps:$4 sm:$0xff]  }
 0x1c0   :  { %v3875_v31 = vpop.f32.mrf.mxu0  ;;  %4120 = vmatmul.mubr.bf16.vlgmr.msra.gmra.mxu0 %v6313_v39  ;;  %4210 = vmatprep.subr.bf16.mxu1 %v5883_v57  ;;  %v5887_v39 = vld [vmem:[#allocation5 + $0xac8] ss:$16 sps:$4 sm:$0xff]  }
 0x1c1   :  { %v3876_v35 = vadd.f32 %v3875_v31, %v6429_v19  ;;  %4170 = vmatpush1.bf16.msra.mxu0 %v5878_v14  ;;  %4201 = vmatprep.mubr.bf16.mxu0 %v6352_v36  ;;  %v3916_v44 = vpop.f32.mrf.mxu1  ;;  %v5890_v36 = vld [vmem:[#allocation5 + $0x8a8] ss:$16 sps:$4 sm:$0xff]   ;;  %v5952_v14 = vld [vmem:[#allocation5 + $0x96c] ss:$16 sps:$4 sm:$0xff]  }
 0x1c2   :  { %4161 = vmatmul.mubr.bf16.vlgmr.msra.gmra.mxu1 %v6315_v42  ;;  %v3877_v52 = vpop.f32.mrf.mxu0  ;;  %4171 = vmatprep.subr.bf16.mxu0 %v5886_v30  ;;  %v5944_v57 = vld [vmem:[#allocation5 + $0x988] ss:$16 sps:$4 sm:$0xff]  }
 0x1c3   :  { %v6439_v54 = vadd.f32 %v3916_v44, %v3876_v35  ;;  %4211 = vmatpush1.bf16.msra.mxu1 %v5881_v38  ;;  %v3878_v40 = vadd.f32 %v3877_v52, %v6433_v24  ;;  %4242 = vmatprep.mubr.bf16.mxu1 %v6356_v48  ;;  %v3918_v45 = vpop.f32.mrf.mxu1  ;;  %v5901_v24 = vld [vmem:[#allocation5 + $0xa8c] ss:$16 sps:$4 sm:$0xff]   ;;  %v5947_v30 = vld [vmem:[#allocation5 + $0xb88] ss:$16 sps:$4 sm:$0xff]  }
 0x1c4   :  { %v3879_v19 = vpop.f32.mrf.mxu0  ;;  %4212 = vmatprep.subr.bf16.mxu1 %v5889_v34  ;;  %v5904_v48 = vld [vmem:[#allocation5 + $0x86c] ss:$16 sps:$4 sm:$0xff]   ;;  %v5950_v31 = vld [vmem:[#allocation5 + $0x968] ss:$16 sps:$4 sm:$0xff]  }
 0x1c5   :  { %v6443_v56 = vadd.f32 %v3918_v45, %v3878_v40  ;;  %4172 = vmatpush1.bf16.msra.mxu0 %v5884_v41  ;;  %v3920_v42 = vpop.f32.mrf.mxu1  ;;  %v5955_v38 = vld [vmem:[#allocation5 + $0xb6c] ss:$16 sps:$4 sm:$0xff]   ;;  %v5953_v35 = vld [vmem:[#allocation5 + $0xb68] ss:$16 sps:$4 sm:$0xff]  }
 0x1c6   :  { %v3880_v49 = vpop.f32.mrf.mxu0  ;;  %4173 = vmatprep.subr.bf16.mxu0 %v5892_v53  ;;  %v5958_v34 = vld [vmem:[#allocation5 + $0x94c] ss:$16 sps:$4 sm:$0xff]   ;;  %v5956_v44 = vld [vmem:[#allocation5 + $0x948] ss:$16 sps:$4 sm:$0xff]  }
 0x1c7   :  { %4213 = vmatpush1.bf16.msra.mxu1 %v5887_v39  ;;  %v3921_v59 = vpop.f32.mrf.mxu1  ;;  %v5961_v41 = vld [vmem:[#allocation5 + $0xb4c] ss:$16 sps:$4 sm:$0xff]   ;;  %v5959_v53 = vld [vmem:[#allocation5 + $0xb48] ss:$16 sps:$4 sm:$0xff]  }
 0x1c8   :  { %4214 = vmatprep.subr.bf16.mxu1 %v5895_v46  ;;  %v5964_v52 = vld [vmem:[#allocation5 + $0x92c] ss:$16 sps:$4 sm:$0xff]   ;;  %v5962_v39 = vld [vmem:[#allocation5 + $0x928] ss:$16 sps:$4 sm:$0xff]  }
 0x1c9   :  { %4174 = vmatpush1.bf16.msra.mxu0 %v5890_v36  ;;  %v5967_v40 = vld [vmem:[#allocation5 + $0xb2c] ss:$16 sps:$4 sm:$0xff]   ;;  %v5965_v19 = vld [vmem:[#allocation5 + $0xb28] ss:$16 sps:$4 sm:$0xff]  }
 0x1ca   :  { %4175 = vmatprep.subr.bf16.mxu0 %v5898_v43  ;;  %v5970_v45 = vld [vmem:[#allocation5 + $0x90c] ss:$16 sps:$4 sm:$0xff]   ;;  %v5968_v36 = vld [vmem:[#allocation5 + $0x908] ss:$16 sps:$4 sm:$0xff]  }
 0x1cb   :  { %4215 = vmatpush1.bf16.msra.mxu1 %v5893_v58  ;;  %v5973_v46 = vld [vmem:[#allocation5 + $0xb0c] ss:$16 sps:$4 sm:$0xff]   ;;  %v5971_v49 = vld [vmem:[#allocation5 + $0xb08] ss:$16 sps:$4 sm:$0xff]  }
 0x1cc   :  { %4216 = vmatprep.subr.bf16.mxu1 %v5901_v24  ;;  %v5976_v42 = vld [vmem:[#allocation5 + $0xcec] ss:$16 sps:$4 sm:$0xff]   ;;  %v5974_v58 = vld [vmem:[#allocation5 + $0xce8] ss:$16 sps:$4 sm:$0xff]  }
 0x1cd   :  { %4176 = vmatpush1.bf16.msra.mxu0 %v5896_v60  ;;  %v5979_v43 = vld [vmem:[#allocation5 + $0xeec] ss:$16 sps:$4 sm:$0xff]   ;;  %v5977_v24 = vld [vmem:[#allocation5 + $0xee8] ss:$16 sps:$4 sm:$0xff]  }
 0x1ce   :  { %4177 = vmatprep.subr.bf16.mxu0 %v5904_v48  ;;  %v5982_v59 = vld [vmem:[#allocation5 + $0xccc] ss:$16 sps:$4 sm:$0xff]  }
 0x1cf   :  { %4217 = vmatpush1.bf16.msra.mxu1 %v5899_v61  ;;  %v5985_v48 = vld [vmem:[#allocation5 + $0xecc] ss:$16 sps:$4 sm:$0xff]  }
 0x1d0   :  { %4218 = vmatprep.subr.bf16.mxu1 %v5907_v62  ;;  %v5980_v62 = vld [vmem:[#allocation5 + $0xcc8] ss:$16 sps:$4 sm:$0xff]  }
 0x1d1   :  { %4178 = vmatpush1.bf16.msra.mxu0 %v5902_v63 }
 0x1d2   :  { %4179 = vmatprep.subr.bf16.mxu0 %v5910_v0 }
 0x1d3   :  { %4219 = vmatpush1.bf16.msra.mxu1 %v5905_v50  ;;  %v5988_v50 = vld [vmem:[#allocation5 + $0xcac] ss:$16 sps:$4 sm:$0xff]  }
 0x1d4   :  { %4220 = vmatprep.subr.bf16.mxu1 %v5913_v1 }
 0x1d5   :  { %4180 = vmatpush1.bf16.msra.mxu0 %v5908_v2  ;;  %v5983_v2 = vld [vmem:[#allocation5 + $0xec8] ss:$16 sps:$4 sm:$0xff]  }
 0x1d6   :  { %4181 = vmatprep.subr.bf16.mxu0 %v5916_v3  ;;  %v5991_v3 = vld [vmem:[#allocation5 + $0xeac] ss:$16 sps:$4 sm:$0xff]  }
 0x1d7   :  { %4221 = vmatpush1.bf16.msra.mxu1 %v5911_v4 }
 0x1d8   :  { %4222 = vmatprep.subr.bf16.mxu1 %v5919_v5 }
 0x1d9   :  { %4182 = vmatpush1.bf16.msra.mxu0 %v5914_v8  ;;  %v5989_v8 = vld [vmem:[#allocation5 + $0xea8] ss:$16 sps:$4 sm:$0xff]  }
 0x1da   :  { %4183 = vmatprep.subr.bf16.mxu0 %v5922_v9 }
 0x1db   :  { %4223 = vmatpush1.bf16.msra.mxu1 %v5917_v10  ;;  %v5997_v10 = vld [vmem:[#allocation5 + $0xe8c] ss:$16 sps:$4 sm:$0xff]  }
 0x1dc   :  { %4224 = vmatprep.subr.bf16.mxu1 %v5925_v11  ;;  %v5992_v11 = vld [vmem:[#allocation5 + $0xc88] ss:$16 sps:$4 sm:$0xff]  }
 0x1dd   :  { %4184 = vmatpush1.bf16.msra.mxu0 %v5920_v12  ;;  %v5995_v12 = vld [vmem:[#allocation5 + $0xe88] ss:$16 sps:$4 sm:$0xff]  }
 0x1de   :  { %4185 = vmatprep.subr.bf16.mxu0 %v5928_v13  ;;  %v6003_v13 = vld [vmem:[#allocation5 + $0xe6c] ss:$16 sps:$4 sm:$0xff]  }
 0x1df   :  { %4225 = vmatpush1.bf16.msra.mxu1 %v5923_v15  ;;  %v5998_v15 = vld [vmem:[#allocation5 + $0xc68] ss:$16 sps:$4 sm:$0xff]  }
 0x1e0   :  { %4226 = vmatprep.subr.bf16.mxu1 %v5931_v16  ;;  %v6006_v16 = vld [vmem:[#allocation5 + $0xc4c] ss:$16 sps:$4 sm:$0xff]  }
 0x1e1   :  { %4186 = vmatpush2.bf16.msra.mxu0 %v5926_v17  ;;  %v6001_v17 = vld [vmem:[#allocation5 + $0xe68] ss:$16 sps:$4 sm:$0xff]  }
 0x1e2   :  { %4187 = vmatprep.subr.bf16.mxu0 %v5934_v47  ;;  %v6009_v47 = vld [vmem:[#allocation5 + $0xe4c] ss:$16 sps:$4 sm:$0xff]  }
 0x1e3   :  { %4227 = vmatpush2.bf16.msra.mxu1 %v5929_v21  ;;  %v6004_v21 = vld [vmem:[#allocation5 + $0xc48] ss:$16 sps:$4 sm:$0xff]  }
 0x1e4   :  { %4228 = vmatprep.subr.bf16.mxu1 %v5937_v22  ;;  %v6012_v22 = vld [vmem:[#allocation5 + $0xc2c] ss:$16 sps:$4 sm:$0xff]  }
 0x1e5   :  { %4188 = vmatpush2.bf16.msra.mxu0 %v5932_v55  ;;  %v6007_v55 = vld [vmem:[#allocation5 + $0xe48] ss:$16 sps:$4 sm:$0xff]  }
 0x1e6   :  { %4189 = vmatprep.subr.bf16.mxu0 %v5940_v23  ;;  %v6015_v23 = vld [vmem:[#allocation5 + $0xe2c] ss:$16 sps:$4 sm:$0xff]  }
 0x1e7   :  { %4229 = vmatpush2.bf16.msra.mxu1 %v5935_v6  ;;  %v6010_v6 = vld [vmem:[#allocation5 + $0xc28] ss:$16 sps:$4 sm:$0xff]  }
 0x1e8   :  { %4230 = vmatprep.subr.bf16.mxu1 %v5943_v26  ;;  %v6018_v26 = vld [vmem:[#allocation5 + $0xc0c] ss:$16 sps:$4 sm:$0xff]  }
 0x1e9   :  { %4190 = vmatpush2.bf16.msra.mxu0 %v5938_v51  ;;  %v6013_v51 = vld [vmem:[#allocation5 + $0xe28] ss:$16 sps:$4 sm:$0xff]  }
 0x1ea   :  { %4191 = vmatprep.subr.bf16.mxu0 %v5946_v28  ;;  %v6021_v28 = vld [vmem:[#allocation5 + $0xe0c] ss:$16 sps:$4 sm:$0xff]  }
 0x1eb   :  { %4231 = vmatpush2.bf16.msra.mxu1 %v5941_v29  ;;  %v6016_v29 = vld [vmem:[#allocation5 + $0xc08] ss:$16 sps:$4 sm:$0xff]  }
 0x1ec   :  { %4232 = vmatprep.subr.bf16.mxu1 %v5949_v32  ;;  %v6024_v32 = vld [vmem:[#allocation5 + $0xdec] ss:$16 sps:$4 sm:$0xff]  }
 0x1ed   :  { %4192 = vmatpush2.bf16.msra.mxu0 %v5944_v57  ;;  %v6019_v57 = vld [vmem:[#allocation5 + $0xe08] ss:$16 sps:$4 sm:$0xff]  }
 0x1ee   :  { %4193 = vmatprep.subr.bf16.mxu0 %v5952_v14  ;;  %v6027_v14 = vld [vmem:[#allocation5 + $0xfec] ss:$16 sps:$4 sm:$0xff]  }
 0x1ef   :  { %4233 = vmatpush2.bf16.msra.mxu1 %v5947_v30  ;;  %v6022_v30 = vld [vmem:[#allocation5 + $0xde8] ss:$16 sps:$4 sm:$0xff]  }
 0x1f0   :  { %4234 = vmatprep.subr.bf16.mxu1 %v5955_v38  ;;  %v6030_v38 = vld [vmem:[#allocation5 + $0xdcc] ss:$16 sps:$4 sm:$0xff]  }
 0x1f1   :  { %4194 = vmatpush2.bf16.msra.mxu0 %v5950_v31  ;;  %v6025_v31 = vld [vmem:[#allocation5 + $0xfe8] ss:$16 sps:$4 sm:$0xff]  }
 0x1f2   :  { %4195 = vmatprep.subr.bf16.mxu0 %v5958_v34  ;;  %v6033_v34 = vld [vmem:[#allocation5 + $0xfcc] ss:$16 sps:$4 sm:$0xff]  }
 0x1f3   :  { %4235 = vmatpush2.bf16.msra.mxu1 %v5953_v35  ;;  %v6028_v35 = vld [vmem:[#allocation5 + $0xdc8] ss:$16 sps:$4 sm:$0xff]  }
 0x1f4   :  { %4236 = vmatprep.subr.bf16.mxu1 %v5961_v41  ;;  %v6036_v41 = vld [vmem:[#allocation5 + $0xdac] ss:$16 sps:$4 sm:$0xff]  }
 0x1f5   :  { %4196 = vmatpush2.bf16.msra.mxu0 %v5956_v44  ;;  %v6031_v44 = vld [vmem:[#allocation5 + $0xfc8] ss:$16 sps:$4 sm:$0xff]  }
 0x1f6   :  { %4197 = vmatprep.subr.bf16.mxu0 %v5964_v52  ;;  %v6039_v52 = vld [vmem:[#allocation5 + $0xfac] ss:$16 sps:$4 sm:$0xff]  }
 0x1f7   :  { %4237 = vmatpush2.bf16.msra.mxu1 %v5959_v53  ;;  %v6034_v53 = vld [vmem:[#allocation5 + $0xda8] ss:$16 sps:$4 sm:$0xff]  }
 0x1f8   :  { %4238 = vmatprep.subr.bf16.mxu1 %v5967_v40  ;;  %v6042_v40 = vld [vmem:[#allocation5 + $0xd8c] ss:$16 sps:$4 sm:$0xff]  }
 0x1f9   :  { %4198 = vmatpush2.bf16.msra.mxu0 %v5962_v39  ;;  %v6037_v39 = vld [vmem:[#allocation5 + $0xfa8] ss:$16 sps:$4 sm:$0xff]  }
 0x1fa   :  { %4199 = vmatprep.subr.bf16.mxu0 %v5970_v45  ;;  %v6045_v45 = vld [vmem:[#allocation5 + $0xf8c] ss:$16 sps:$4 sm:$0xff]  }
 0x1fb   :  { %4239 = vmatpush2.bf16.msra.mxu1 %v5965_v19  ;;  %v6040_v19 = vld [vmem:[#allocation5 + $0xd88] ss:$16 sps:$4 sm:$0xff]  }
 0x1fc   :  { %4240 = vmatprep.subr.bf16.mxu1 %v5973_v46  ;;  %v6048_v46 = vld [vmem:[#allocation5 + $0xd6c] ss:$16 sps:$4 sm:$0xff]  }
 0x1fd   :  { %4200 = vmatpush2.bf16.msra.mxu0 %v5968_v36  ;;  %v6043_v36 = vld [vmem:[#allocation5 + $0xf88] ss:$16 sps:$4 sm:$0xff]  }
 0x1fe   :  { %4251 = vmatprep.subr.bf16.mxu0 %v5976_v42  ;;  %v6051_v42 = vld [vmem:[#allocation5 + $0xf6c] ss:$16 sps:$4 sm:$0xff]  }
 0x1ff   :  { %4241 = vmatpush2.bf16.msra.mxu1 %v5971_v49  ;;  %v6046_v49 = vld [vmem:[#allocation5 + $0xd68] ss:$16 sps:$4 sm:$0xff]  }
 0x200   :  { %v3957_v60 = vpop.f32.mrf.mxu0  ;;  %4202 = vmatmul.mubr.bf16.vlgmr.msra.gmra.mxu0 %v6385_v18  ;;  %4292 = vmatprep.subr.bf16.mxu1 %v5979_v43  ;;  %v6054_v43 = vld [vmem:[#allocation5 + $0xd4c] ss:$16 sps:$4 sm:$0xff]  }
 0x201   :  { %v3958_v61 = vadd.f32 %v3957_v60, %v6439_v54  ;;  %4252 = vmatpush1.bf16.msra.mxu0 %v5974_v58  ;;  %4283 = vmatprep.mubr.bf16.mxu0 %v6392_v20  ;;  %v5986_v20 = vld [vmem:[#allocation5 + $0xca8] ss:$16 sps:$4 sm:$0xff]   ;;  %v6060_v60 = vld [vmem:[#allocation5 + $0xd2c] ss:$16 sps:$4 sm:$0xff]  }
 0x202   :  { %v3998_v63 = vpop.f32.mrf.mxu1  ;;  %4243 = vmatmul.mubr.bf16.vlgmr.msra.gmra.mxu1 %v6387_v25  ;;  %v6449_v0 = vpop.f32.mrf.mxu0  ;;  %4253 = vmatprep.subr.bf16.mxu0 %v5982_v59  ;;  %v5994_v25 = vld [vmem:[#allocation5 + $0xc8c] ss:$16 sps:$4 sm:$0xff]   ;;  %v6049_v58 = vld [vmem:[#allocation5 + $0xf68] ss:$16 sps:$4 sm:$0xff]  }
 0x203   :  { %v6451_v1 = vadd.f32 %v3998_v63, %v3958_v61  ;;  %4293 = vmatpush1.bf16.msra.mxu1 %v5977_v24  ;;  %4324 = vmatprep.mubr.bf16.mxu1 %v6400_v33  ;;  %v6000_v33 = vld [vmem:[#allocation5 + $0xc6c] ss:$16 sps:$4 sm:$0xff]   ;;  %v6052_v24 = vld [vmem:[#allocation5 + $0xd48] ss:$16 sps:$4 sm:$0xff]  }
 0x204   :  { %v6454_v18 = vpop.f32.mrf.mxu1  ;;  %v3961_v54 = vpop.f32.mrf.mxu0  ;;  %4294 = vmatprep.subr.bf16.mxu1 %v5985_v48  ;;  %v6057_v59 = vld [vmem:[#allocation5 + $0xf4c] ss:$16 sps:$4 sm:$0xff]   ;;  %v3960_v48 = vadd.f32 %v6449_v0, %v6443_v56  ;;  %v6055_v61 = vld [vmem:[#allocation5 + $0xf48] ss:$16 sps:$4 sm:$0xff]  }
 0x205   :  { %4254 = vmatpush1.bf16.msra.mxu0 %v5980_v62  ;;  %v6063_v62 = vld [vmem:[#allocation5 + $0xf2c] ss:$16 sps:$4 sm:$0xff]   ;;  %v6058_v63 = vld [vmem:[#allocation5 + $0xd28] ss:$16 sps:$4 sm:$0xff]  }
 0x206   :  { %v4002_v4 = vpop.f32.mrf.mxu1  ;;  %v3962_v5 = vpop.f32.mrf.mxu0  ;;  %4255 = vmatprep.subr.bf16.mxu0 %v5988_v50  ;;  %v6066_v50 = vld [vmem:[#allocation5 + $0xd0c] ss:$16 sps:$4 sm:$0xff]   ;;  %v6061_v54 = vld [vmem:[#allocation5 + $0xf28] ss:$16 sps:$4 sm:$0xff]  }
 0x207   :  { %4295 = vmatpush1.bf16.msra.mxu1 %v5983_v2  ;;  %v4001_v2 = vadd.f32 %v6454_v18, %v3960_v48  ;;  %v994_v4 = vsub.s32 2, %v6407_v7  ;;  %v6070_v56 = vld [vmem:[#allocation8 + $0x78] sm:$0xff]   ;;  %v6067_v5 = vld [vmem:[#allocation5 + $0xf08] ss:$16 sps:$4 sm:$0xff]  }
 0x208   :  { %v4003_v9 = vpop.f32.mrf.mxu1  ;;  %4296 = vmatprep.subr.bf16.mxu1 %v5991_v3  ;;  %v6069_v3 = vld [vmem:[#allocation5 + $0xf0c] ss:$16 sps:$4 sm:$0xff]  }
 0x209   :  { %4256 = vmatpush1.bf16.msra.mxu0 %v5986_v20  ;;  %v6064_v20 = vld [vmem:[#allocation5 + $0xd08] ss:$16 sps:$4 sm:$0xff]   ;;  %v4334_v0 = vmax.f32 %v4001_v2, 0.0  ;;  %v6071_v18 = vld [vmem:[#allocation8 + $0x38] sm:$0xff]  }
 0x20a   :  { %4257 = vmatprep.subr.bf16.mxu0 %v5994_v25  ;;  %v998_v25 = vsub.s32 3, %v6407_v7 }
 0x20b   :  { %4297 = vmatpush1.bf16.msra.mxu1 %v5989_v8  ;;  %v6102_v8 = vld [vmem:[#allocation7] sm:$0xf] }
 0x20c   :  { %4298 = vmatprep.subr.bf16.mxu1 %v5997_v10  ;;  %v995_v9 = vrot.slane %v6102_v8, %v994_v4  ;;  %v6072_v10 = vld [vmem:[#allocation8 + $0x70] sm:$0xff]   ;;  %v6100_v4 = vld [vmem:[#allocation8 + $0xc0] sm:$0xff]  }
 0x20d   :  { %4258 = vmatpush1.bf16.msra.mxu0 %v5992_v11  ;;  %v4338_v11 = vpack.c.bf16 %v4334_v0, %v4334_v0 }
 0x20e   :  { %4259 = vmatprep.subr.bf16.mxu0 %v6000_v33  ;;  %v999_v33 = vrot.slane %v6102_v8, %v998_v25 }
 0x20f   :  { %4299 = vmatpush1.bf16.msra.mxu1 %v5995_v12 }
 0x210   :  { %4300 = vmatprep.subr.bf16.mxu1 %v6003_v13 }
 0x211   :  { %4260 = vmatpush1.bf16.msra.mxu0 %v5998_v15  ;;  %v6073_v15 = vld [vmem:[#allocation8 + $0x30] sm:$0xff]  }
 0x212   :  { %4261 = vmatprep.subr.bf16.mxu0 %v6006_v16 }
 0x213   :  { %4301 = vmatpush1.bf16.msra.mxu1 %v6001_v17  ;;  %v6074_v17 = vld [vmem:[#allocation8 + $0x68] sm:$0xff]  }
 0x214   :  { %4302 = vmatprep.subr.bf16.mxu1 %v6009_v47 }
 0x215   :  { %4262 = vmatpush1.bf16.msra.mxu0 %v6004_v21 }
 0x216   :  { %4263 = vmatprep.subr.bf16.mxu0 %v6012_v22 }
 0x217   :  { %4303 = vmatpush1.bf16.msra.mxu1 %v6007_v55 }
 0x218   :  { %4304 = vmatprep.subr.bf16.mxu1 %v6015_v23 }
 0x219   :  { %4264 = vmatpush1.bf16.msra.mxu0 %v6010_v6  ;;  %v6075_v6 = vld [vmem:[#allocation8 + $0x28] sm:$0xff]  }
 0x21a   :  { %4265 = vmatprep.subr.bf16.mxu0 %v6018_v26 }
 0x21b   :  { %4305 = vmatpush1.bf16.msra.mxu1 %v6013_v51 }
 0x21c   :  { %4306 = vmatprep.subr.bf16.mxu1 %v6021_v28 }
 0x21d   :  { %4266 = vmatpush1.bf16.msra.mxu0 %v6016_v29  ;;  %v6086_v29 = vld [vmem:[#allocation8 + $0xf8] sm:$0xff]  }
 0x21e   :  { %4267 = vmatprep.subr.bf16.mxu0 %v6024_v32  ;;  %v6087_v32 = vld [vmem:[#allocation8 + $0xb8] sm:$0xff]  }
 0x21f   :  { %4307 = vmatpush1.bf16.msra.mxu1 %v6019_v57  ;;  %v6088_v57 = vld [vmem:[#allocation8 + $0xf0] sm:$0xff]  }
 0x220   :  { %4308 = vmatprep.subr.bf16.mxu1 %v6027_v14  ;;  %v6078_v14 = vld [vmem:[#allocation8 + $0x58] sm:$0xff]  }
 0x221   :  { %4268 = vmatpush2.bf16.msra.mxu0 %v6022_v30  ;;  %v6089_v30 = vld [vmem:[#allocation8 + $0xb0] sm:$0xff]  }
 0x222   :  { %4269 = vmatprep.subr.bf16.mxu0 %v6030_v38  ;;  %v6090_v38 = vld [vmem:[#allocation8 + $0xe8] sm:$0xff]  }
 0x223   :  { %4309 = vmatpush2.bf16.msra.mxu1 %v6025_v31  ;;  %v6079_v31 = vld [vmem:[#allocation8 + $0x18] sm:$0xff]  }
 0x224   :  { %4310 = vmatprep.subr.bf16.mxu1 %v6033_v34  ;;  %v6080_v34 = vld [vmem:[#allocation8 + $0x50] sm:$0xff]  }
 0x225   :  { %4270 = vmatpush2.bf16.msra.mxu0 %v6028_v35  ;;  %v6091_v35 = vld [vmem:[#allocation8 + $0xa8] sm:$0xff]  }
 0x226   :  { %4271 = vmatprep.subr.bf16.mxu0 %v6036_v41  ;;  %v6092_v41 = vld [vmem:[#allocation8 + $0xe0] sm:$0xff]  }
 0x227   :  { %4311 = vmatpush2.bf16.msra.mxu1 %v6031_v44  ;;  %v6081_v44 = vld [vmem:[#allocation8 + $0x10] sm:$0xff]  }
 0x228   :  { %4312 = vmatprep.subr.bf16.mxu1 %v6039_v52  ;;  %v6082_v52 = vld [vmem:[#allocation8 + $0x48] sm:$0xff]  }
 0x229   :  { %4272 = vmatpush2.bf16.msra.mxu0 %v6034_v53  ;;  %v6093_v53 = vld [vmem:[#allocation8 + $0xa0] sm:$0xff]  }
 0x22a   :  { %4273 = vmatprep.subr.bf16.mxu0 %v6042_v40  ;;  %v6094_v40 = vld [vmem:[#allocation8 + $0xd8] sm:$0xff]  }
 0x22b   :  { %4313 = vmatpush2.bf16.msra.mxu1 %v6037_v39  ;;  %v6083_v39 = vld [vmem:[#allocation8 + $0x8] sm:$0xff]  }
 0x22c   :  { %4314 = vmatprep.subr.bf16.mxu1 %v6045_v45  ;;  %v6084_v45 = vld [vmem:[#allocation8 + $0x40] sm:$0xff]  }
 0x22d   :  { %4274 = vmatpush2.bf16.msra.mxu0 %v6040_v19  ;;  %v6095_v19 = vld [vmem:[#allocation8 + $0x98] sm:$0xff]  }
 0x22e   :  { %4275 = vmatprep.subr.bf16.mxu0 %v6048_v46  ;;  %v6085_v46 = vld [vmem:[#allocation8] sm:$0xff]  }
 0x22f   :  { %4315 = vmatpush2.bf16.msra.mxu1 %v6043_v36  ;;  %v4333_v36 = vmax.f32 %v6451_v1, 0.0  ;;  %v6099_v1 = vld [vmem:[#allocation8 + $0x88] sm:$0xff]  }
 0x230   :  { %4316 = vmatprep.subr.bf16.mxu1 %v6051_v42 }
 0x231   :  { %4276 = vmatpush2.bf16.msra.mxu0 %v6046_v49  ;;  %v4337_v42 = vpack.c.bf16 %v4333_v36, %v4333_v36 }
 0x232   :  { %4277 = vmatprep.subr.bf16.mxu0 %v6054_v43  ;;  %v6096_v43 = vld [vmem:[#allocation8 + $0xd0] sm:$0xff]  }
 0x233   :  { %4317 = vmatpush2.bf16.msra.mxu1 %v6049_v58 }
 0x234   :  { %4318 = vmatprep.subr.bf16.mxu1 %v6057_v59  ;;  %v6097_v59 = vld [vmem:[#allocation8 + $0x90] sm:$0xff]  }
 0x235   :  { %4278 = vmatpush2.bf16.msra.mxu0 %v6052_v24 }
 0x236   :  { %4279 = vmatprep.subr.bf16.mxu0 %v6060_v60 }
 0x237   :  { %4319 = vmatpush2.bf16.msra.mxu1 %v6055_v61 }
 0x238   :  { %4320 = vmatprep.subr.bf16.mxu1 %v6063_v62 }
 0x239   :  { %4280 = vmatpush2.bf16.msra.mxu0 %v6058_v63 }
 0x23a   :  { %4281 = vmatprep.subr.bf16.mxu0 %v6066_v50  ;;  %v6098_v50 = vld [vmem:[#allocation8 + $0xc8] sm:$0xff]  }
 0x23b   :  { %4321 = vmatpush2.bf16.msra.mxu1 %v6061_v54 }
 0x23c   :  { %4322 = vmatprep.subr.bf16.mxu1 %v6069_v3 }
 0x23d   :  { %4282 = vmatpush2.bf16.msra.mxu0 %v6064_v20 }
 0x23e   :  { %5247 = vmatprep.subr.bf16.mxu0 %v6070_v56  ;;  %v6101_v56 = vld [vmem:[#allocation8 + $0x80] sm:$0xff]  }
 0x23f   :  { %4323 = vmatpush2.bf16.msra.mxu1 %v6067_v5 }
 0x240   :  { %v4039_v12 = vpop.f32.mrf.mxu0  ;;  %4284 = vmatmul.mubr.bf16.vlgmr.msra.gmra.mxu0 %v6413_v27  ;;  %v6076_v27 = vld [vmem:[#allocation8 + $0x60] sm:$0xff]   ;;  %5269 = vmatprep.subr.bf16.mxu1 %v6086_v29 }
 0x241   :  { %v4040_v13 = vadd.f32 %v4039_v12, %v995_v9  ;;  %5248 = vmatpush3.bf16.msra.mxu0 %v6071_v18  ;;  %4636 = vmatprep.mubr.bf16.mxu0 %v4338_v11 }
 0x242   :  { %v4080_v16 = vpop.f32.mrf.mxu1  ;;  %4325 = vmatmul.mubr.bf16.vlgmr.msra.gmra.mxu1 %v6415_v37  ;;  %v4041_v7 = vpop.f32.mrf.mxu0  ;;  %5249 = vmatprep.subr.bf16.mxu0 %v6072_v10  ;;  %v6077_v37 = vld [vmem:[#allocation8 + $0x20] sm:$0xff]  }
 0x243   :  { %v4081_v47 = vadd.f32 %v4080_v16, %v4040_v13  ;;  %v4042_v21 = vadd.f32 %v4041_v7, %v999_v33  ;;  %5270 = vmatpush3.bf16.msra.mxu1 %v6087_v32 }
 0x244   :  { %v4082_v22 = vpop.f32.mrf.mxu1  ;;  %v4043_v55 = vpop.f32.mrf.mxu0  ;;  %5271 = vmatprep.subr.bf16.mxu1 %v6088_v57 }
 0x245   :  { %v4083_v23 = vadd.f32 %v4082_v22, %v4042_v21  ;;  %5250 = vmatpush3.bf16.msra.mxu0 %v6073_v15 }
 0x246   :  { %v4084_v26 = vpop.f32.mrf.mxu1  ;;  %v4044_v51 = vpop.f32.mrf.mxu0  ;;  %5251 = vmatprep.subr.bf16.mxu0 %v6074_v17 }
 0x247   :  { %5272 = vmatpush3.bf16.msra.mxu1 %v6089_v30 }
 0x248   :  { %v4085_v28 = vpop.f32.mrf.mxu1  ;;  %5273 = vmatprep.subr.bf16.mxu1 %v6090_v38 }
 0x249   :  { %5252 = vmatpush3.bf16.msra.mxu0 %v6075_v6 }
 0x24a   :  { %5253 = vmatprep.subr.bf16.mxu0 %v6076_v27 }
 0x24b   :  { %5274 = vmatpush3.bf16.msra.mxu1 %v6091_v35 }
 0x24c   :  { %5275 = vmatprep.subr.bf16.mxu1 %v6092_v41 }
 0x24d   :  { %5254 = vmatpush3.bf16.msra.mxu0 %v6077_v37 }
 0x24e   :  { %5255 = vmatprep.subr.bf16.mxu0 %v6078_v14 }
 0x24f   :  { %5276 = vmatpush3.bf16.msra.mxu1 %v6093_v53 }
 0x250   :  { %5277 = vmatprep.subr.bf16.mxu1 %v6094_v40 }
 0x251   :  { %5256 = vmatpush3.bf16.msra.mxu0 %v6079_v31 }
 0x252   :  { %5257 = vmatprep.subr.bf16.mxu0 %v6080_v34  ;;  %v5214_v34 = vld [vmem:[#allocation10] ss:$0 sm:$0xff] }
 0x253   :  { %5278 = vmatpush3.bf16.msra.mxu1 %v6095_v19 }
 0x254   :  { %5279 = vmatprep.subr.bf16.mxu1 %v6096_v43 }
 0x255   :  { %5258 = vmatpush3.bf16.msra.mxu0 %v6081_v44 }
 0x256   :  { %5259 = vmatprep.subr.bf16.mxu0 %v6082_v52 }
 0x257   :  { %5280 = vmatpush3.bf16.msra.mxu1 %v6097_v59 }
 0x258   :  { %5281 = vmatprep.subr.bf16.mxu1 %v6098_v50 }
 0x259   :  { %5260 = vmatpush3.bf16.msra.mxu0 %v6083_v39 }
 0x25a   :  { %5261 = vmatprep.subr.bf16.mxu0 %v6084_v45 }
 0x25b   :  { %5282 = vmatpush3.bf16.msra.mxu1 %v6099_v1 }
 0x25c   :  { %5283 = vmatprep.subr.bf16.mxu1 %v6100_v4 }
 0x25d   :  { %5262 = vmatpush3.bf16.msra.mxu0 %v6085_v46 }
 0x25f   :  { %5284 = vmatpush3.bf16.msra.mxu1 %v6101_v56 }
 0x260   :  { %4637 = vmatmul.mubr.bf16.vlgmr.msra.gmra.mxu0 %v4337_v42 }
 0x280   :  { %v4121_v49 = vpop.f32.mrf.mxu0 }
 0x281   :  { %v4122_v58 = vadd.f32 %v4121_v49, %v4081_v47 }
 0x282   :  { %v4162_v24 = vpop.f32.mrf.mxu1  ;;  %v4123_v60 = vpop.f32.mrf.mxu0 }
 0x283   :  { %v4163_v48 = vadd.f32 %v4162_v24, %v4122_v58  ;;  %v4124_v61 = vadd.f32 %v4123_v60, %v4083_v23 }
 0x284   :  { %v4164_v62 = vpop.f32.mrf.mxu1  ;;  %v4125_v63 = vpop.f32.mrf.mxu0 }
 0x285   :  { %v4165_v2 = vadd.f32 %v4164_v62, %v4124_v61 }
 0x286   :  { %v4166_v54 = vpop.f32.mrf.mxu1  ;;  %v4126_v3 = vpop.f32.mrf.mxu0 }
 0x288   :  { %v4167_v20 = vpop.f32.mrf.mxu1 }
 0x2c0   :  { %v4203_v0 = vpop.f32.mrf.mxu0 }
 0x2c1   :  { %v4204_v33 = vadd.f32 %v4203_v0, %v4163_v48 }
 0x2c2   :  { %v4244_v5 = vpop.f32.mrf.mxu1  ;;  %v4205_v25 = vpop.f32.mrf.mxu0 }
 0x2c3   :  { %v4206_v12 = vadd.f32 %v4205_v25, %v4165_v2  ;;  %v4245_v13 = vadd.f32 %v4244_v5, %v4204_v33 }
 0x2c4   :  { %v4246_v8 = vpop.f32.mrf.mxu1  ;;  %v4207_v9 = vpop.f32.mrf.mxu0 }
 0x2c5   :  { %v4247_v16 = vadd.f32 %v4246_v8, %v4206_v12 }
 0x2c6   :  { %v4248_v18 = vpop.f32.mrf.mxu1  ;;  %v4208_v10 = vpop.f32.mrf.mxu0 }
 0x2c8   :  { %v4249_v11 = vpop.f32.mrf.mxu1 }
 0x300   :  { %v4285_v15 = vpop.f32.mrf.mxu0 }
 0x301   :  { %v4286_v7 = vadd.f32 %v4285_v15, %v4245_v13 }
 0x302   :  { %v4326_v17 = vpop.f32.mrf.mxu1  ;;  %v4287_v47 = vpop.f32.mrf.mxu0 }
 0x303   :  { %v4327_v21 = vadd.f32 %v4326_v17, %v4286_v7  ;;  %v4288_v22 = vadd.f32 %v4287_v47, %v4247_v16 }
 0x304   :  { %v4328_v55 = vpop.f32.mrf.mxu1  ;;  %v4289_v23 = vpop.f32.mrf.mxu0 }
 0x305   :  { %v4329_v6 = vadd.f32 %v4328_v55, %v4288_v22  ;;  %v4335_v26 = vmax.f32 %v4327_v21, 0.0 }
 0x306   :  { %v4330_v51 = vpop.f32.mrf.mxu1  ;;  %v4290_v27 = vpop.f32.mrf.mxu0 }
 0x307   :  { %v4336_v28 = vmax.f32 %v4329_v6, 0.0  ;;  %v4339_v57 = vpack.c.bf16 %v4335_v26, %v4335_v26 }
 0x308   :  { %v4331_v29 = vpop.f32.mrf.mxu1 }
 0x309   :  { %v4340_v32 = vpack.c.bf16 %v4336_v28, %v4336_v28 }
 0x30b   :  { %4676 = vmatprep.mubr.bf16.mxu1 %v4340_v32 }
 0x30c   :  { %4677 = vmatmul.mubr.bf16.vlgmr.msra.gmra.mxu1 %v4339_v57 }
 0x320   :  { %v5263_v37 = vpop.f32.mrf.mxu0 }
 0x322   :  { %v5264_v14 = vpop.f32.mrf.mxu0 }
 0x323   :  { %v5265_v30 = vadd.f32 %v5264_v14, %v5263_v37 }
 0x324   :  { %v5266_v38 = vpop.f32.mrf.mxu0 }
 0x325   :  { %v4639_v44 = vadd.f32 %v5265_v30, %v5214_v34 }
 0x326   :  { %v5267_v31 = vpop.f32.mrf.mxu0 }
 0x3cc   :  { %v5285_v35 = vpop.f32.mrf.mxu1 }
 0x3ce   :  { %v5286_v41 = vpop.f32.mrf.mxu1 }
 0x3cf   :  { %v5287_v52 = vadd.f32 %v5286_v41, %v5285_v35 }
 0x3d0   :  { %v5288_v53 = vpop.f32.mrf.mxu1 }
 0x3d1   :  { %v4679_v40 = vadd.f32 %v5287_v52, %v4639_v44 }
 0x3d2   :  { %v5289_v39 = vpop.f32.mrf.mxu1 }
 0x3d3   :  { %4684 = vst [vmem:[#allocation11] sm:$0x3] %v4679_v40 }
 0x3d4   :  { %6214 = shalt.err (!%p6211_p1)
}
 0x3d5   :  { %4694 = dma.vmem_to_hbm [thread:$0]  %s4692_s4, 32, %s6472_s5, [#allocation4]  }
 0x3d6   :  { %6229 = dma.done.wait [#allocation4], 32  }
 0x3d7   :  { %6230 = vsyncadd [#allocation4], 4294967264 }
 0x3d8   :  { %4698 = vsyncpa [#allocation3], 1 }
 0x3d9   :  { %4699 = vsyncpa [#allocation6], 1 }
 0x3da   :  { %4700 = vsyncpa [#allocation9], 1 }
 0x3db   :  { %4701 = vsyncpa [#allocation4], 1 }

</bundles_post_ra>
